<compile_context>
chip_gen: v7x
topology: tpu7x:2x2x1
jax: 0.10.0
libtpu: 0.0.40
codegen_flags: <defaults>
</compile_context>

<pallas_src>
import jax
import jax.numpy as jnp
from jax.experimental import pallas as pl
from jax.experimental.pallas import tpu as pltpu

D_MODEL = 64            # token dim
N_HEADS = 4
HEAD_DIM = D_MODEL // N_HEADS
D_FF = 2048             # nn.TransformerEncoderLayer default dim_feedforward
DEPTH = 4
EPS = 1e-5              # LayerNorm eps (PyTorch default)


def _layer_norm(x, gamma, beta):
    mu = jnp.mean(x, axis=-1, keepdims=True)
    xc = x - mu
    var = jnp.mean(xc * xc, axis=-1, keepdims=True)
    return xc * jax.lax.rsqrt(var + EPS) * gamma + beta


# --------------------------- fused Pallas kernel ---------------------------
def fused_encoder_kernel(x_ref, mask_ref, wqkv_ref, wo_ref, w1_ref, b1_ref,
                         w2_ref, vecs_ref, o_ref):
    layer = pl.program_id(0)

    # Running activation lives in the resident output block (constant index map).
    @pl.when(layer == 0)
    def _init():
        o_ref[...] = x_ref[...]

    x = o_ref[...]                    # (B, S, D) f32
    B, S, Dm = x.shape
    mask = mask_ref[...]              # (B, 1, S) additive key-padding bias

    wqkv = wqkv_ref[0]                # (D, 3D)  bf16   [wq | wk | wv]
    wo = wo_ref[0]                    # (D, D)   bf16
    w1 = w1_ref[0]                    # (D, F)   bf16
    b1 = b1_ref[0]                    # (1, F)   f32
    w2 = w2_ref[0]                    # (F, D)   bf16
    vecs = vecs_ref[0]                # (16, D)  f32 packed small vectors
    bq, bk, bv = vecs[0:1], vecs[1:2], vecs[2:3]
    bo, g1, be1 = vecs[3:4], vecs[4:5], vecs[5:6]
    b2, g2, be2 = vecs[6:7], vecs[7:8], vecs[8:9]

    scale = 1.0 / (HEAD_DIM ** 0.5)

    # ---- fused QKV projection: one lane-dense (B*S, 64) @ (64, 192) matmul ----
    xf = x.reshape(B * S, Dm).astype(jnp.bfloat16)
    qkv = jnp.dot(xf, wqkv, preferred_element_type=jnp.float32)     # (B*S, 3D) f32
    q = (qkv[:, 0:Dm] + bq).reshape(B, S, Dm)
    k = (qkv[:, Dm:2 * Dm] + bk).reshape(B, S, Dm)
    v = (qkv[:, 2 * Dm:3 * Dm] + bv).reshape(B, S, Dm)

    dn_qk = (((2,), (2,)), ((0,), (0,)))    # contract head_dim, batch over B
    dn_ctx = (((2,), (1,)), ((0,), (0,)))   # contract keys,     batch over B

    # ---- self attention (dropout disabled = eval semantics) ----
    ctx_heads = []
    for h in range(N_HEADS):                # static, tiny (4)
        lo, hi = h * HEAD_DIM, (h + 1) * HEAD_DIM
        qh, kh, vh = q[:, :, lo:hi], k[:, :, lo:hi], v[:, :, lo:hi]
        s = jax.lax.dot_general(qh, kh, dn_qk,
                                preferred_element_type=jnp.float32) * scale
        s = s + mask                                    # (B,S,S) + (B,1,S)
        s = s - jnp.max(s, axis=-1, keepdims=True)
        p = jnp.exp(s)
        p = p * pl.reciprocal(jnp.sum(p, axis=-1, keepdims=True), approx=True)
        ctx_heads.append(jax.lax.dot_general(p, vh, dn_ctx,
                                             preferred_element_type=jnp.float32))
    ctx = jnp.concatenate(ctx_heads, axis=-1)           # (B, S, D)

    # single output projection on concatenated heads
    attn = jnp.dot(ctx.reshape(B * S, Dm).astype(jnp.bfloat16), wo,
                   preferred_element_type=jnp.float32) + bo         # (B*S, D)

    x1 = _layer_norm(x + attn.reshape(B, S, Dm), g1, be1)           # fp32 norm math

    # ---- feed-forward: Linear -> ReLU -> Linear (rows = B*S) ----
    xf1 = x1.reshape(B * S, Dm).astype(jnp.bfloat16)
    hid = jnp.dot(xf1, w1, preferred_element_type=jnp.float32) + b1
    hid = jnp.maximum(hid, 0.0)
    ffn = jnp.dot(hid.astype(jnp.bfloat16), w2,
                  preferred_element_type=jnp.float32) + b2

    x2 = _layer_norm(x1 + ffn.reshape(B, S, Dm), g2, be2)
    o_ref[...] = x2.astype(o_ref.dtype)


# ------------------------------ host wrapper -------------------------------
def pack_params(params_list):
    """Stack per-layer params with a leading layer axis (x @ W convention).

    NOTE: real PyTorch nn.TransformerEncoder weights (in_proj_weight (3D,D),
    out_proj.weight, linear{1,2}.weight) are stored transposed w.r.t. this
    x @ W convention and would need a `.T` here before packing.
    """
    wqkv_l, wo_l, w1_l, b1_l, w2_l, vecs_l = [], [], [], [], [], []
    zeros = jnp.zeros((1, D_MODEL), jnp.float32)
    for p in params_list:
        (wq, bq, wk, bk, wv, bv, wo, bo, g1, be1, w1, b1, w2, b2, g2, be2) = p
        wqkv_l.append(jnp.concatenate([wq, wk, wv], axis=1))                # (D, 3D)
        wo_l.append(wo)                                                     # (D, D)
        w1_l.append(w1)
        b1_l.append(b1)
        w2_l.append(w2)
        vecs_l.append(jnp.concatenate(
            [bq, bk, bv, bo, g1, be1, b2, g2, be2] + [zeros] * 7, axis=0))  # (16, D)

    return dict(
        wqkv=jnp.stack(wqkv_l).astype(jnp.bfloat16),   # (L, D, 3D)
        wo=jnp.stack(wo_l).astype(jnp.bfloat16),       # (L, D, D)
        w1=jnp.stack(w1_l).astype(jnp.bfloat16),       # (L, D, D_FF)
        b1=jnp.stack(b1_l).astype(jnp.float32),        # (L, 1, D_FF)
        w2=jnp.stack(w2_l).astype(jnp.bfloat16),       # (L, D_FF, D)
        vecs=jnp.stack(vecs_l).astype(jnp.float32),    # (L, 16, D)
    )


def _build_forward(B, S, Dm, L, dff, weight_bufs):
    def const_block(shape):
        n = len(shape)
        return pl.BlockSpec(shape, lambda l, _n=n: (0,) * _n)

    def layer_block(shape, deep=False):
        n = len(shape)
        idx = lambda l, _n=n: (l,) + (0,) * _n
        if deep and weight_bufs is not None:
            # fetch later layers' weights while earlier layers compute
            return pl.BlockSpec((1,) + shape, idx,
                                pipeline_mode=pl.Buffered(weight_bufs))
        return pl.BlockSpec((1,) + shape, idx)

    in_specs = [
        const_block((B, S, Dm)),              # x (loaded once)
        const_block((B, 1, S)),               # key-padding bias
        layer_block((Dm, 3 * Dm), deep=True), # fused wqkv
        layer_block((Dm, Dm)),                # wo
        layer_block((Dm, dff), deep=True),    # w1
        layer_block((1, dff)),                # b1
        layer_block((dff, Dm), deep=True),    # w2
        layer_block((16, Dm)),                # packed small vectors
    ]
    return pl.pallas_call(
        fused_encoder_kernel,
        out_shape=jax.ShapeDtypeStruct((B, S, Dm), jnp.float32),
        grid=(L,),
        in_specs=in_specs,
        out_specs=const_block((B, S, Dm)),    # resident accumulator across layers
        compiler_params=pltpu.CompilerParams(
            dimension_semantics=("arbitrary",)),
    )


def transformer_block_forward(z_q, mask_bias, packed):
    B, S, Dm = z_q.shape
    L = packed["wqkv"].shape[0]
    dff = packed["w1"].shape[2]
    args = (z_q, mask_bias, packed["wqkv"], packed["wo"], packed["w1"],
            packed["b1"], packed["w2"], packed["vecs"])
    try:
        return jax.block_until_ready(_build_forward(B, S, Dm, L, dff, 3)(*args))
    except Exception:
        # TODO(synk): pl.Buffered weight pipelining unavailable on this jax/libtpu;
        # fall back to the default double-buffered pipeline (same semantics).
        return jax.block_until_ready(_build_forward(B, S, Dm, L, dff, None)(*args))


# ---------------- deterministic parameter init (synthetic) ----------------
def init_params(key, depth):
    layers = []
    for i in range(depth):
        ks = jax.random.split(jax.random.fold_in(key, i), 10)
        s = 0.05
        wq = jax.random.normal(ks[0], (D_MODEL, D_MODEL), jnp.float32) * s
        wk = jax.random.normal(ks[1], (D_MODEL, D_MODEL), jnp.float32) * s
        wv = jax.random.normal(ks[2], (D_MODEL, D_MODEL), jnp.float32) * s
        wo = jax.random.normal(ks[3], (D_MODEL, D_MODEL), jnp.float32) * s
        bq = jax.random.normal(ks[4], (1, D_MODEL), jnp.float32) * 0.01
        bk = jax.random.normal(ks[5], (1, D_MODEL), jnp.float32) * 0.01
        bv = jax.random.normal(ks[6], (1, D_MODEL), jnp.float32) * 0.01
        bo = jnp.zeros((1, D_MODEL), jnp.float32)
        w1 = jax.random.normal(ks[7], (D_MODEL, D_FF), jnp.float32) * s
        b1 = jax.random.normal(ks[8], (1, D_FF), jnp.float32) * 0.01
        w2 = jax.random.normal(ks[9], (D_FF, D_MODEL), jnp.float32) * s
        b2 = jnp.zeros((1, D_MODEL), jnp.float32)
        g1 = jnp.ones((1, D_MODEL), jnp.float32)
        be1 = jnp.zeros((1, D_MODEL), jnp.float32)
        g2 = jnp.ones((1, D_MODEL), jnp.float32)
        be2 = jnp.zeros((1, D_MODEL), jnp.float32)
        layers.append((wq, bq, wk, bk, wv, bv, wo, bo,
                       g1, be1, w1, b1, w2, b2, g2, be2))
    return layers


# ---------------- pure-JAX references (sanity checks) ----------------
def _ref_layer(x, mask_bias, p, wdtype):
    (wq, bq, wk, bk, wv, bv, wo, bo, g1, be1, w1, b1, w2, b2, g2, be2) = p
    B, S, Dm = x.shape

    def mm(a, w):
        return jnp.dot(a.astype(wdtype), w.astype(wdtype),
                       preferred_element_type=jnp.float32)

    xf = x.reshape(B * S, Dm)
    q = (mm(xf, wq) + bq).reshape(B, S, N_HEADS, HEAD_DIM)
    k = (mm(xf, wk) + bk).reshape(B, S, N_HEADS, HEAD_DIM)
    v = (mm(xf, wv) + bv).reshape(B, S, N_HEADS, HEAD_DIM)
    s = jnp.einsum('bqhd,bkhd->bhqk', q, k) / (HEAD_DIM ** 0.5)
    s = s + mask_bias[:, :, None, :]
    p_attn = jax.nn.softmax(s, axis=-1)
    ctx = jnp.einsum('bhqk,bkhd->bqhd', p_attn, v).reshape(B, S, Dm)
    attn = (mm(ctx.reshape(B * S, Dm), wo) + bo).reshape(B, S, Dm)
    x1 = _layer_norm(x + attn, g1, be1)
    h = mm(x1.reshape(B * S, Dm), w1) + b1
    h = jnp.maximum(h, 0.0)
    h = mm(h, w2) + b2
    return _layer_norm(x1 + h.reshape(B, S, Dm), g2, be2)


def ref_decoder(z_q, mask_bias, params_list, wdtype):
    x = z_q
    for p in params_list:
        x = _ref_layer(x, mask_bias, p, wdtype)
    return x


if __name__ == "__main__":
    key = jax.random.PRNGKey(0)
    B, S = 2, 8
    k_x, k_p = jax.random.split(key, 2)

    z_q = jax.random.normal(k_x, (B, S, D_MODEL), dtype=jnp.float32)
    # PyTorch key_padding_mask: True = ignore. Pad last 2 tokens of batch 1.
    padding_mask = jnp.zeros((B, S), dtype=bool).at[1, -2:].set(True)
    mask_bias = jnp.where(padding_mask, -1e9, 0.0).astype(jnp.float32).reshape(B, 1, S)

    params_list = init_params(k_p, DEPTH)
    packed = pack_params(params_list)

    out = transformer_block_forward(z_q, mask_bias, packed)
    out = jax.block_until_ready(out)

    # Reference 1: mirrors the kernel's bf16 matmul inputs (tight tolerance).
    ref_bf16 = jax.block_until_ready(ref_decoder(z_q, mask_bias, params_list, jnp.bfloat16))
    # Reference 2: pure fp32 semantics (loose tolerance; covers bf16 quantization drift).
    ref_f32 = jax.block_until_ready(ref_decoder(z_q, mask_bias, params_list, jnp.float32))

    assert out.shape == (B, S, D_MODEL)
    diff_bf16 = float(jnp.max(jnp.abs(out - ref_bf16)))
    diff_f32 = float(jnp.max(jnp.abs(out - ref_f32)))
    assert diff_bf16 < 2e-2, f"kernel vs bf16-mirrored reference mismatch: {diff_bf16}"
    assert diff_f32 < 2e-1, f"kernel vs fp32 reference mismatch: {diff_f32}"

    # NOTE: pl.reciprocal(approx=True) in the softmax denominator -> rows sum to
    # 1 only to ~1e-3 relative; covered by the tolerances above.
    # TODO(synk): dropout (p=0.1) is implemented in eval mode (identity);
    # training-mode stochastic dropout is not reproduced.
    print("KERNEL_OK")
</pallas_src>

<mosaic_0001>
module attributes {stable_mosaic.version = 11 : i64} {
  func.func @fused_encoder_kernel(%arg0: i32, %arg1: memref<2x8x64xf32, #tpu.memory_space<vmem>>, %arg2: memref<2x1x8xf32, #tpu.memory_space<vmem>>, %arg3: memref<1x64x192xbf16, #tpu.memory_space<vmem>>, %arg4: memref<1x64x64xbf16, #tpu.memory_space<vmem>>, %arg5: memref<1x64x2048xbf16, #tpu.memory_space<vmem>>, %arg6: memref<1x1x2048xf32, #tpu.memory_space<vmem>>, %arg7: memref<1x2048x64xbf16, #tpu.memory_space<vmem>>, %arg8: memref<1x16x64xf32, #tpu.memory_space<vmem>>, %arg9: memref<2x8x64xf32, #tpu.memory_space<vmem>>) attributes {dimension_semantics = [#tpu.dimension_semantics<arbitrary>], iteration_bounds = array<i64: 4>, scalar_prefetch = 0 : i64, scratch_operands = 0 : i64, tpu.core_type = #tpu.core_type<tc>, window_params = [{pipeline_mode = #tpu.pipeline_mode<synchronous>, transform_indices = @transform_0, window_bounds = array<i64: 2, 8, 64>}, {pipeline_mode = #tpu.pipeline_mode<synchronous>, transform_indices = @transform_1, window_bounds = array<i64: 2, 1, 8>}, {transform_indices = @transform_2, window_bounds = array<i64: 1, 64, 192>}, {transform_indices = @transform_3, window_bounds = array<i64: 1, 64, 64>}, {transform_indices = @transform_4, window_bounds = array<i64: 1, 64, 2048>}, {transform_indices = @transform_5, window_bounds = array<i64: 1, 1, 2048>}, {transform_indices = @transform_6, window_bounds = array<i64: 1, 2048, 64>}, {transform_indices = @transform_7, window_bounds = array<i64: 1, 16, 64>}, {pipeline_mode = #tpu.pipeline_mode<synchronous>, transform_indices = @transform_8, window_bounds = array<i64: 2, 8, 64>}]} {
    %c0_i32 = arith.constant 0 : i32
    %0 = arith.cmpi eq, %arg0, %c0_i32 : i32
    %1 = arith.extui %0 : i1 to i32
    %c0_i32_0 = arith.constant 0 : i32
    %2 = arith.cmpi ne, %1, %c0_i32_0 : i32
    scf.if %2 {
      %c0_61 = arith.constant 0 : index
      %c0_62 = arith.constant 0 : index
      %c0_63 = arith.constant 0 : index
      %183 = vector.load %arg1[%c0_61, %c0_62, %c0_63] : memref<2x8x64xf32, #tpu.memory_space<vmem>>, vector<2x8x64xf32>
      %c0_64 = arith.constant 0 : index
      %c0_65 = arith.constant 0 : index
      %c0_66 = arith.constant 0 : index
      %184 = vector.load %arg9[%c0_64, %c0_65, %c0_66] : memref<2x8x64xf32, #tpu.memory_space<vmem>>, vector<2x8x64xf32>
      tpu.vector_store %arg9[%c0_64, %c0_65, %c0_66], %183 {strides = array<i32>} : memref<2x8x64xf32, #tpu.memory_space<vmem>>, vector<2x8x64xf32>,
    } else {
    }
    %c0 = arith.constant 0 : index
    %c0_1 = arith.constant 0 : index
    %c0_2 = arith.constant 0 : index
    %3 = vector.load %arg9[%c0, %c0_1, %c0_2] : memref<2x8x64xf32, #tpu.memory_space<vmem>>, vector<2x8x64xf32>
    %c0_3 = arith.constant 0 : index
    %c0_4 = arith.constant 0 : index
    %c0_5 = arith.constant 0 : index
    %4 = vector.load %arg2[%c0_3, %c0_4, %c0_5] : memref<2x1x8xf32, #tpu.memory_space<vmem>>, vector<2x1x8xf32>
    %c0_6 = arith.constant 0 : index
    %c0_7 = arith.constant 0 : index
    %c0_8 = arith.constant 0 : index
    %5 = vector.load %arg3[%c0_6, %c0_7, %c0_8] : memref<1x64x192xbf16, #tpu.memory_space<vmem>>, vector<1x64x192xbf16>
    %6 = vector.shape_cast %5 : vector<1x64x192xbf16> to vector<64x192xbf16>
    %c0_9 = arith.constant 0 : index
    %c0_10 = arith.constant 0 : index
    %c0_11 = arith.constant 0 : index
    %7 = vector.load %arg4[%c0_9, %c0_10, %c0_11] : memref<1x64x64xbf16, #tpu.memory_space<vmem>>, vector<1x64x64xbf16>
    %8 = vector.shape_cast %7 : vector<1x64x64xbf16> to vector<64x64xbf16>
    %c0_12 = arith.constant 0 : index
    %c0_13 = arith.constant 0 : index
    %c0_14 = arith.constant 0 : index
    %9 = vector.load %arg5[%c0_12, %c0_13, %c0_14] : memref<1x64x2048xbf16, #tpu.memory_space<vmem>>, vector<1x64x2048xbf16>
    %10 = vector.shape_cast %9 : vector<1x64x2048xbf16> to vector<64x2048xbf16>
    %c0_15 = arith.constant 0 : index
    %c0_16 = arith.constant 0 : index
    %c0_17 = arith.constant 0 : index
    %11 = vector.load %arg6[%c0_15, %c0_16, %c0_17] : memref<1x1x2048xf32, #tpu.memory_space<vmem>>, vector<1x1x2048xf32>
    %12 = vector.shape_cast %11 : vector<1x1x2048xf32> to vector<1x2048xf32>
    %c0_18 = arith.constant 0 : index
    %c0_19 = arith.constant 0 : index
    %c0_20 = arith.constant 0 : index
    %13 = vector.load %arg7[%c0_18, %c0_19, %c0_20] : memref<1x2048x64xbf16, #tpu.memory_space<vmem>>, vector<1x2048x64xbf16>
    %14 = vector.shape_cast %13 : vector<1x2048x64xbf16> to vector<2048x64xbf16>
    %c0_21 = arith.constant 0 : index
    %c0_22 = arith.constant 0 : index
    %c0_23 = arith.constant 0 : index
    %15 = vector.load %arg8[%c0_21, %c0_22, %c0_23] : memref<1x16x64xf32, #tpu.memory_space<vmem>>, vector<1x16x64xf32>
    %16 = vector.shape_cast %15 : vector<1x16x64xf32> to vector<16x64xf32>
    %17 = vector.extract_strided_slice %16 {offsets = [0, 0], sizes = [1, 64], strides = [1, 1]} : vector<16x64xf32> to vector<1x64xf32>
    %18 = vector.extract_strided_slice %16 {offsets = [1, 0], sizes = [1, 64], strides = [1, 1]} : vector<16x64xf32> to vector<1x64xf32>
    %19 = vector.extract_strided_slice %16 {offsets = [2, 0], sizes = [1, 64], strides = [1, 1]} : vector<16x64xf32> to vector<1x64xf32>
    %20 = vector.extract_strided_slice %16 {offsets = [3, 0], sizes = [1, 64], strides = [1, 1]} : vector<16x64xf32> to vector<1x64xf32>
    %21 = vector.extract_strided_slice %16 {offsets = [4, 0], sizes = [1, 64], strides = [1, 1]} : vector<16x64xf32> to vector<1x64xf32>
    %22 = vector.extract_strided_slice %16 {offsets = [5, 0], sizes = [1, 64], strides = [1, 1]} : vector<16x64xf32> to vector<1x64xf32>
    %23 = vector.extract_strided_slice %16 {offsets = [6, 0], sizes = [1, 64], strides = [1, 1]} : vector<16x64xf32> to vector<1x64xf32>
    %24 = vector.extract_strided_slice %16 {offsets = [7, 0], sizes = [1, 64], strides = [1, 1]} : vector<16x64xf32> to vector<1x64xf32>
    %25 = vector.extract_strided_slice %16 {offsets = [8, 0], sizes = [1, 64], strides = [1, 1]} : vector<16x64xf32> to vector<1x64xf32>
    %26 = vector.shape_cast %3 : vector<2x8x64xf32> to vector<16x64xf32>
    %27 = arith.truncf %26 : vector<16x64xf32> to vector<16x64xbf16>
    %cst = arith.constant dense<0.000000e+00> : vector<16x192xf32>
    %28 = tpu.matmul %27, %6, %cst {dimension_numbers = #tpu.dot_dimension_numbers<[1], [0], [0], [1], [0, 0, 1, 1], [], []>} : vector<16x64xbf16>, vector<64x192xbf16>, vector<16x192xf32> -> vector<16x192xf32>
    %29 = vector.extract_strided_slice %28 {offsets = [0, 0], sizes = [16, 64], strides = [1, 1]} : vector<16x192xf32> to vector<16x64xf32>
    %30 = vector.broadcast %17 : vector<1x64xf32> to vector<16x64xf32>
    %31 = arith.addf %29, %30 : vector<16x64xf32>
    %32 = vector.shape_cast %31 : vector<16x64xf32> to vector<2x8x64xf32>
    %33 = vector.extract_strided_slice %28 {offsets = [0, 64], sizes = [16, 64], strides = [1, 1]} : vector<16x192xf32> to vector<16x64xf32>
    %34 = vector.broadcast %18 : vector<1x64xf32> to vector<16x64xf32>
    %35 = arith.addf %33, %34 : vector<16x64xf32>
    %36 = vector.shape_cast %35 : vector<16x64xf32> to vector<2x8x64xf32>
    %37 = vector.extract_strided_slice %28 {offsets = [0, 128], sizes = [16, 64], strides = [1, 1]} : vector<16x192xf32> to vector<16x64xf32>
    %38 = vector.broadcast %19 : vector<1x64xf32> to vector<16x64xf32>
    %39 = arith.addf %37, %38 : vector<16x64xf32>
    %40 = vector.shape_cast %39 : vector<16x64xf32> to vector<2x8x64xf32>
    %41 = vector.extract_strided_slice %32 {offsets = [0, 0, 0], sizes = [2, 8, 16], strides = [1, 1, 1]} : vector<2x8x64xf32> to vector<2x8x16xf32>
    %42 = vector.extract_strided_slice %36 {offsets = [0, 0, 0], sizes = [2, 8, 16], strides = [1, 1, 1]} : vector<2x8x64xf32> to vector<2x8x16xf32>
    %43 = vector.extract_strided_slice %40 {offsets = [0, 0, 0], sizes = [2, 8, 16], strides = [1, 1, 1]} : vector<2x8x64xf32> to vector<2x8x16xf32>
    %cst_24 = arith.constant dense<0.000000e+00> : vector<2x8x8xf32>
    %44 = tpu.matmul %41, %42, %cst_24 {dimension_numbers = #tpu.dot_dimension_numbers<[2], [2], [1], [1], [0, 0, 0, 1, 1, 1], [0], [0]>} : vector<2x8x16xf32>, vector<2x8x16xf32>, vector<2x8x8xf32> -> vector<2x8x8xf32>
    %cst_25 = arith.constant 2.500000e-01 : f32
    %45 = vector.broadcast %cst_25 : f32 to vector<2x8x8xf32>
    %46 = arith.mulf %44, %45 : vector<2x8x8xf32>
    %47 = vector.broadcast %4 : vector<2x1x8xf32> to vector<2x8x8xf32>
    %48 = arith.addf %46, %47 : vector<2x8x8xf32>
    %cst_26 = arith.constant dense<0xFF800000> : vector<2x8xf32>
    %49 = vector.multi_reduction <maximumf>, %48, %cst_26 [2] : vector<2x8x8xf32> to vector<2x8xf32>
    %50 = vector.shape_cast %49 : vector<2x8xf32> to vector<2x8x1xf32>
    %51 = vector.broadcast %50 : vector<2x8x1xf32> to vector<2x8x8xf32>
    %52 = arith.subf %48, %51 : vector<2x8x8xf32>
    %53 = math.exp %52 : vector<2x8x8xf32>
    %cst_27 = arith.constant dense<0.000000e+00> : vector<2x8xf32>
    %54 = vector.multi_reduction <add>, %53, %cst_27 [2] : vector<2x8x8xf32> to vector<2x8xf32>
    %55 = vector.shape_cast %54 : vector<2x8xf32> to vector<2x8x1xf32>
    %56 = tpu.reciprocal %55 {approx = true} : vector<2x8x1xf32> -> vector<2x8x1xf32>
    %57 = vector.broadcast %56 : vector<2x8x1xf32> to vector<2x8x8xf32>
    %58 = arith.mulf %53, %57 : vector<2x8x8xf32>
    %cst_28 = arith.constant dense<0.000000e+00> : vector<2x8x16xf32>
    %59 = tpu.matmul %58, %43, %cst_28 {dimension_numbers = #tpu.dot_dimension_numbers<[2], [1], [1], [2], [0, 0, 0, 1, 1, 2], [0], [0]>} : vector<2x8x8xf32>, vector<2x8x16xf32>, vector<2x8x16xf32> -> vector<2x8x16xf32>
    %60 = vector.extract_strided_slice %32 {offsets = [0, 0, 16], sizes = [2, 8, 16], strides = [1, 1, 1]} : vector<2x8x64xf32> to vector<2x8x16xf32>
    %61 = vector.extract_strided_slice %36 {offsets = [0, 0, 16], sizes = [2, 8, 16], strides = [1, 1, 1]} : vector<2x8x64xf32> to vector<2x8x16xf32>
    %62 = vector.extract_strided_slice %40 {offsets = [0, 0, 16], sizes = [2, 8, 16], strides = [1, 1, 1]} : vector<2x8x64xf32> to vector<2x8x16xf32>
    %cst_29 = arith.constant dense<0.000000e+00> : vector<2x8x8xf32>
    %63 = tpu.matmul %60, %61, %cst_29 {dimension_numbers = #tpu.dot_dimension_numbers<[2], [2], [1], [1], [0, 0, 0, 1, 1, 1], [0], [0]>} : vector<2x8x16xf32>, vector<2x8x16xf32>, vector<2x8x8xf32> -> vector<2x8x8xf32>
    %cst_30 = arith.constant 2.500000e-01 : f32
    %64 = vector.broadcast %cst_30 : f32 to vector<2x8x8xf32>
    %65 = arith.mulf %63, %64 : vector<2x8x8xf32>
    %66 = vector.broadcast %4 : vector<2x1x8xf32> to vector<2x8x8xf32>
    %67 = arith.addf %65, %66 : vector<2x8x8xf32>
    %cst_31 = arith.constant dense<0xFF800000> : vector<2x8xf32>
    %68 = vector.multi_reduction <maximumf>, %67, %cst_31 [2] : vector<2x8x8xf32> to vector<2x8xf32>
    %69 = vector.shape_cast %68 : vector<2x8xf32> to vector<2x8x1xf32>
    %70 = vector.broadcast %69 : vector<2x8x1xf32> to vector<2x8x8xf32>
    %71 = arith.subf %67, %70 : vector<2x8x8xf32>
    %72 = math.exp %71 : vector<2x8x8xf32>
    %cst_32 = arith.constant dense<0.000000e+00> : vector<2x8xf32>
    %73 = vector.multi_reduction <add>, %72, %cst_32 [2] : vector<2x8x8xf32> to vector<2x8xf32>
    %74 = vector.shape_cast %73 : vector<2x8xf32> to vector<2x8x1xf32>
    %75 = tpu.reciprocal %74 {approx = true} : vector<2x8x1xf32> -> vector<2x8x1xf32>
    %76 = vector.broadcast %75 : vector<2x8x1xf32> to vector<2x8x8xf32>
    %77 = arith.mulf %72, %76 : vector<2x8x8xf32>
    %cst_33 = arith.constant dense<0.000000e+00> : vector<2x8x16xf32>
    %78 = tpu.matmul %77, %62, %cst_33 {dimension_numbers = #tpu.dot_dimension_numbers<[2], [1], [1], [2], [0, 0, 0, 1, 1, 2], [0], [0]>} : vector<2x8x8xf32>, vector<2x8x16xf32>, vector<2x8x16xf32> -> vector<2x8x16xf32>
    %79 = vector.extract_strided_slice %32 {offsets = [0, 0, 32], sizes = [2, 8, 16], strides = [1, 1, 1]} : vector<2x8x64xf32> to vector<2x8x16xf32>
    %80 = vector.extract_strided_slice %36 {offsets = [0, 0, 32], sizes = [2, 8, 16], strides = [1, 1, 1]} : vector<2x8x64xf32> to vector<2x8x16xf32>
    %81 = vector.extract_strided_slice %40 {offsets = [0, 0, 32], sizes = [2, 8, 16], strides = [1, 1, 1]} : vector<2x8x64xf32> to vector<2x8x16xf32>
    %cst_34 = arith.constant dense<0.000000e+00> : vector<2x8x8xf32>
    %82 = tpu.matmul %79, %80, %cst_34 {dimension_numbers = #tpu.dot_dimension_numbers<[2], [2], [1], [1], [0, 0, 0, 1, 1, 1], [0], [0]>} : vector<2x8x16xf32>, vector<2x8x16xf32>, vector<2x8x8xf32> -> vector<2x8x8xf32>
    %cst_35 = arith.constant 2.500000e-01 : f32
    %83 = vector.broadcast %cst_35 : f32 to vector<2x8x8xf32>
    %84 = arith.mulf %82, %83 : vector<2x8x8xf32>
    %85 = vector.broadcast %4 : vector<2x1x8xf32> to vector<2x8x8xf32>
    %86 = arith.addf %84, %85 : vector<2x8x8xf32>
    %cst_36 = arith.constant dense<0xFF800000> : vector<2x8xf32>
    %87 = vector.multi_reduction <maximumf>, %86, %cst_36 [2] : vector<2x8x8xf32> to vector<2x8xf32>
    %88 = vector.shape_cast %87 : vector<2x8xf32> to vector<2x8x1xf32>
    %89 = vector.broadcast %88 : vector<2x8x1xf32> to vector<2x8x8xf32>
    %90 = arith.subf %86, %89 : vector<2x8x8xf32>
    %91 = math.exp %90 : vector<2x8x8xf32>
    %cst_37 = arith.constant dense<0.000000e+00> : vector<2x8xf32>
    %92 = vector.multi_reduction <add>, %91, %cst_37 [2] : vector<2x8x8xf32> to vector<2x8xf32>
    %93 = vector.shape_cast %92 : vector<2x8xf32> to vector<2x8x1xf32>
    %94 = tpu.reciprocal %93 {approx = true} : vector<2x8x1xf32> -> vector<2x8x1xf32>
    %95 = vector.broadcast %94 : vector<2x8x1xf32> to vector<2x8x8xf32>
    %96 = arith.mulf %91, %95 : vector<2x8x8xf32>
    %cst_38 = arith.constant dense<0.000000e+00> : vector<2x8x16xf32>
    %97 = tpu.matmul %96, %81, %cst_38 {dimension_numbers = #tpu.dot_dimension_numbers<[2], [1], [1], [2], [0, 0, 0, 1, 1, 2], [0], [0]>} : vector<2x8x8xf32>, vector<2x8x16xf32>, vector<2x8x16xf32> -> vector<2x8x16xf32>
    %98 = vector.extract_strided_slice %32 {offsets = [0, 0, 48], sizes = [2, 8, 16], strides = [1, 1, 1]} : vector<2x8x64xf32> to vector<2x8x16xf32>
    %99 = vector.extract_strided_slice %36 {offsets = [0, 0, 48], sizes = [2, 8, 16], strides = [1, 1, 1]} : vector<2x8x64xf32> to vector<2x8x16xf32>
    %100 = vector.extract_strided_slice %40 {offsets = [0, 0, 48], sizes = [2, 8, 16], strides = [1, 1, 1]} : vector<2x8x64xf32> to vector<2x8x16xf32>
    %cst_39 = arith.constant dense<0.000000e+00> : vector<2x8x8xf32>
    %101 = tpu.matmul %98, %99, %cst_39 {dimension_numbers = #tpu.dot_dimension_numbers<[2], [2], [1], [1], [0, 0, 0, 1, 1, 1], [0], [0]>} : vector<2x8x16xf32>, vector<2x8x16xf32>, vector<2x8x8xf32> -> vector<2x8x8xf32>
    %cst_40 = arith.constant 2.500000e-01 : f32
    %102 = vector.broadcast %cst_40 : f32 to vector<2x8x8xf32>
    %103 = arith.mulf %101, %102 : vector<2x8x8xf32>
    %104 = vector.broadcast %4 : vector<2x1x8xf32> to vector<2x8x8xf32>
    %105 = arith.addf %103, %104 : vector<2x8x8xf32>
    %cst_41 = arith.constant dense<0xFF800000> : vector<2x8xf32>
    %106 = vector.multi_reduction <maximumf>, %105, %cst_41 [2] : vector<2x8x8xf32> to vector<2x8xf32>
    %107 = vector.shape_cast %106 : vector<2x8xf32> to vector<2x8x1xf32>
    %108 = vector.broadcast %107 : vector<2x8x1xf32> to vector<2x8x8xf32>
    %109 = arith.subf %105, %108 : vector<2x8x8xf32>
    %110 = math.exp %109 : vector<2x8x8xf32>
    %cst_42 = arith.constant dense<0.000000e+00> : vector<2x8xf32>
    %111 = vector.multi_reduction <add>, %110, %cst_42 [2] : vector<2x8x8xf32> to vector<2x8xf32>
    %112 = vector.shape_cast %111 : vector<2x8xf32> to vector<2x8x1xf32>
    %113 = tpu.reciprocal %112 {approx = true} : vector<2x8x1xf32> -> vector<2x8x1xf32>
    %114 = vector.broadcast %113 : vector<2x8x1xf32> to vector<2x8x8xf32>
    %115 = arith.mulf %110, %114 : vector<2x8x8xf32>
    %cst_43 = arith.constant dense<0.000000e+00> : vector<2x8x16xf32>
    %116 = tpu.matmul %115, %100, %cst_43 {dimension_numbers = #tpu.dot_dimension_numbers<[2], [1], [1], [2], [0, 0, 0, 1, 1, 2], [0], [0]>} : vector<2x8x8xf32>, vector<2x8x16xf32>, vector<2x8x16xf32> -> vector<2x8x16xf32>
    %117 = tpu.concatenate %59, %78, %97, %116 in 2 : vector<2x8x16xf32>, vector<2x8x16xf32>, vector<2x8x16xf32>, vector<2x8x16xf32> -> vector<2x8x64xf32>
    %118 = vector.shape_cast %117 : vector<2x8x64xf32> to vector<16x64xf32>
    %119 = arith.truncf %118 : vector<16x64xf32> to vector<16x64xbf16>
    %cst_44 = arith.constant dense<0.000000e+00> : vector<16x64xf32>
    %120 = tpu.matmul %119, %8, %cst_44 {dimension_numbers = #tpu.dot_dimension_numbers<[1], [0], [0], [1], [0, 0, 1, 1], [], []>} : vector<16x64xbf16>, vector<64x64xbf16>, vector<16x64xf32> -> vector<16x64xf32>
    %121 = vector.broadcast %20 : vector<1x64xf32> to vector<16x64xf32>
    %122 = arith.addf %120, %121 : vector<16x64xf32>
    %123 = vector.shape_cast %122 : vector<16x64xf32> to vector<2x8x64xf32>
    %124 = arith.addf %3, %123 : vector<2x8x64xf32>
    %cst_45 = arith.constant dense<0.000000e+00> : vector<2x8xf32>
    %125 = vector.multi_reduction <add>, %124, %cst_45 [2] : vector<2x8x64xf32> to vector<2x8xf32>
    %126 = vector.shape_cast %125 : vector<2x8xf32> to vector<2x8x1xf32>
    %cst_46 = arith.constant 6.400000e+01 : f32
    %127 = vector.broadcast %cst_46 : f32 to vector<2x8x1xf32>
    %128 = arith.divf %126, %127 : vector<2x8x1xf32>
    %129 = vector.broadcast %128 : vector<2x8x1xf32> to vector<2x8x64xf32>
    %130 = arith.subf %124, %129 : vector<2x8x64xf32>
    %131 = arith.mulf %130, %130 : vector<2x8x64xf32>
    %cst_47 = arith.constant dense<0.000000e+00> : vector<2x8xf32>
    %132 = vector.multi_reduction <add>, %131, %cst_47 [2] : vector<2x8x64xf32> to vector<2x8xf32>
    %133 = vector.shape_cast %132 : vector<2x8xf32> to vector<2x8x1xf32>
    %cst_48 = arith.constant 6.400000e+01 : f32
    %134 = vector.broadcast %cst_48 : f32 to vector<2x8x1xf32>
    %135 = arith.divf %133, %134 : vector<2x8x1xf32>
    %cst_49 = arith.constant 9.99999974E-6 : f32
    %136 = vector.broadcast %cst_49 : f32 to vector<2x8x1xf32>
    %137 = arith.addf %135, %136 : vector<2x8x1xf32>
    %138 = math.rsqrt %137 : vector<2x8x1xf32>
    %139 = vector.broadcast %138 : vector<2x8x1xf32> to vector<2x8x64xf32>
    %140 = arith.mulf %130, %139 : vector<2x8x64xf32>
    %141 = vector.shape_cast %21 : vector<1x64xf32> to vector<1x1x64xf32>
    %142 = vector.broadcast %141 : vector<1x1x64xf32> to vector<2x8x64xf32>
    %143 = arith.mulf %140, %142 : vector<2x8x64xf32>
    %144 = vector.shape_cast %22 : vector<1x64xf32> to vector<1x1x64xf32>
    %145 = vector.broadcast %144 : vector<1x1x64xf32> to vector<2x8x64xf32>
    %146 = arith.addf %143, %145 : vector<2x8x64xf32>
    %147 = vector.shape_cast %146 : vector<2x8x64xf32> to vector<16x64xf32>
    %148 = arith.truncf %147 : vector<16x64xf32> to vector<16x64xbf16>
    %cst_50 = arith.constant dense<0.000000e+00> : vector<16x2048xf32>
    %149 = tpu.matmul %148, %10, %cst_50 {dimension_numbers = #tpu.dot_dimension_numbers<[1], [0], [0], [1], [0, 0, 1, 1], [], []>} : vector<16x64xbf16>, vector<64x2048xbf16>, vector<16x2048xf32> -> vector<16x2048xf32>
    %150 = vector.broadcast %12 : vector<1x2048xf32> to vector<16x2048xf32>
    %151 = arith.addf %149, %150 : vector<16x2048xf32>
    %cst_51 = arith.constant 0.000000e+00 : f32
    %152 = vector.broadcast %cst_51 : f32 to vector<16x2048xf32>
    %153 = arith.maximumf %151, %152 : vector<16x2048xf32>
    %154 = arith.truncf %153 : vector<16x2048xf32> to vector<16x2048xbf16>
    %cst_52 = arith.constant dense<0.000000e+00> : vector<16x64xf32>
    %155 = tpu.matmul %154, %14, %cst_52 {dimension_numbers = #tpu.dot_dimension_numbers<[1], [0], [0], [1], [0, 0, 1, 1], [], []>} : vector<16x2048xbf16>, vector<2048x64xbf16>, vector<16x64xf32> -> vector<16x64xf32>
    %156 = vector.broadcast %23 : vector<1x64xf32> to vector<16x64xf32>
    %157 = arith.addf %155, %156 : vector<16x64xf32>
    %158 = vector.shape_cast %157 : vector<16x64xf32> to vector<2x8x64xf32>
    %159 = arith.addf %146, %158 : vector<2x8x64xf32>
    %cst_53 = arith.constant dense<0.000000e+00> : vector<2x8xf32>
    %160 = vector.multi_reduction <add>, %159, %cst_53 [2] : vector<2x8x64xf32> to vector<2x8xf32>
    %161 = vector.shape_cast %160 : vector<2x8xf32> to vector<2x8x1xf32>
    %cst_54 = arith.constant 6.400000e+01 : f32
    %162 = vector.broadcast %cst_54 : f32 to vector<2x8x1xf32>
    %163 = arith.divf %161, %162 : vector<2x8x1xf32>
    %164 = vector.broadcast %163 : vector<2x8x1xf32> to vector<2x8x64xf32>
    %165 = arith.subf %159, %164 : vector<2x8x64xf32>
    %166 = arith.mulf %165, %165 : vector<2x8x64xf32>
    %cst_55 = arith.constant dense<0.000000e+00> : vector<2x8xf32>
    %167 = vector.multi_reduction <add>, %166, %cst_55 [2] : vector<2x8x64xf32> to vector<2x8xf32>
    %168 = vector.shape_cast %167 : vector<2x8xf32> to vector<2x8x1xf32>
    %cst_56 = arith.constant 6.400000e+01 : f32
    %169 = vector.broadcast %cst_56 : f32 to vector<2x8x1xf32>
    %170 = arith.divf %168, %169 : vector<2x8x1xf32>
    %cst_57 = arith.constant 9.99999974E-6 : f32
    %171 = vector.broadcast %cst_57 : f32 to vector<2x8x1xf32>
    %172 = arith.addf %170, %171 : vector<2x8x1xf32>
    %173 = math.rsqrt %172 : vector<2x8x1xf32>
    %174 = vector.broadcast %173 : vector<2x8x1xf32> to vector<2x8x64xf32>
    %175 = arith.mulf %165, %174 : vector<2x8x64xf32>
    %176 = vector.shape_cast %24 : vector<1x64xf32> to vector<1x1x64xf32>
    %177 = vector.broadcast %176 : vector<1x1x64xf32> to vector<2x8x64xf32>
    %178 = arith.mulf %175, %177 : vector<2x8x64xf32>
    %179 = vector.shape_cast %25 : vector<1x64xf32> to vector<1x1x64xf32>
    %180 = vector.broadcast %179 : vector<1x1x64xf32> to vector<2x8x64xf32>
    %181 = arith.addf %178, %180 : vector<2x8x64xf32>
    %c0_58 = arith.constant 0 : index
    %c0_59 = arith.constant 0 : index
    %c0_60 = arith.constant 0 : index
    %182 = vector.load %arg9[%c0_58, %c0_59, %c0_60] : memref<2x8x64xf32, #tpu.memory_space<vmem>>, vector<2x8x64xf32>
    tpu.vector_store %arg9[%c0_58, %c0_59, %c0_60], %181 {strides = array<i32>} : memref<2x8x64xf32, #tpu.memory_space<vmem>>, vector<2x8x64xf32>,
    return
  }
  func.func @transform_0(%arg0: i32) -> (i32, i32, i32) {
    %c0_i32 = arith.constant 0 : i32
    %c0_i32_0 = arith.constant 0 : i32
    %c0_i32_1 = arith.constant 0 : i32
    %c0_i32_2 = arith.constant 0 : i32
    return %c0_i32, %c0_i32_0, %c0_i32_1 : i32, i32, i32
  }
  func.func @transform_1(%arg0: i32) -> (i32, i32, i32) {
    %c0_i32 = arith.constant 0 : i32
    %c0_i32_0 = arith.constant 0 : i32
    %c0_i32_1 = arith.constant 0 : i32
    %c0_i32_2 = arith.constant 0 : i32
    return %c0_i32, %c0_i32_0, %c0_i32_1 : i32, i32, i32
  }
  func.func @transform_2(%arg0: i32) -> (i32, i32, i32) {
    %c0_i32 = arith.constant 0 : i32
    %c0_i32_0 = arith.constant 0 : i32
    %c0_i32_1 = arith.constant 0 : i32
    return %arg0, %c0_i32, %c0_i32_0 : i32, i32, i32
  }
  func.func @transform_3(%arg0: i32) -> (i32, i32, i32) {
    %c0_i32 = arith.constant 0 : i32
    %c0_i32_0 = arith.constant 0 : i32
    %c0_i32_1 = arith.constant 0 : i32
    return %arg0, %c0_i32, %c0_i32_0 : i32, i32, i32
  }
  func.func @transform_4(%arg0: i32) -> (i32, i32, i32) {
    %c0_i32 = arith.constant 0 : i32
    %c0_i32_0 = arith.constant 0 : i32
    %c0_i32_1 = arith.constant 0 : i32
    return %arg0, %c0_i32, %c0_i32_0 : i32, i32, i32
  }
  func.func @transform_5(%arg0: i32) -> (i32, i32, i32) {
    %c0_i32 = arith.constant 0 : i32
    %c0_i32_0 = arith.constant 0 : i32
    %c0_i32_1 = arith.constant 0 : i32
    return %arg0, %c0_i32, %c0_i32_0 : i32, i32, i32
  }
  func.func @transform_6(%arg0: i32) -> (i32, i32, i32) {
    %c0_i32 = arith.constant 0 : i32
    %c0_i32_0 = arith.constant 0 : i32
    %c0_i32_1 = arith.constant 0 : i32
    return %arg0, %c0_i32, %c0_i32_0 : i32, i32, i32
  }
  func.func @transform_7(%arg0: i32) -> (i32, i32, i32) {
    %c0_i32 = arith.constant 0 : i32
    %c0_i32_0 = arith.constant 0 : i32
    %c0_i32_1 = arith.constant 0 : i32
    return %arg0, %c0_i32, %c0_i32_0 : i32, i32, i32
  }
  func.func @transform_8(%arg0: i32) -> (i32, i32, i32) {
    %c0_i32 = arith.constant 0 : i32
    %c0_i32_0 = arith.constant 0 : i32
    %c0_i32_1 = arith.constant 0 : i32
    %c0_i32_2 = arith.constant 0 : i32
    return %c0_i32, %c0_i32_0, %c0_i32_1 : i32, i32, i32
  }
}

</mosaic_0001>

<bundles_post_ra>
// kernel: tpu_custom_call.1
= control target key start
LH: loop header
LB: loop body
LE: loop exit
PB: predicated region body
PF: predicated region fallthrough
CT: control target
= control target key end

     0   :  { %13 = vsyncpa [#allocation3], 0  ;;  %s5289_s27 = smov 0   ;;  %s5905_s0 = inlined_call_operand.vmem [shape: f32[2,8,64], index: 0, kind: input, shape index: {}]   ;;  %s5906_s1 = inlined_call_operand.vmem [shape: f32[2,1,8], index: 1, kind: input, shape index: {}]   ;;  %s5907_s2 = inlined_call_operand.vmem [shape: bf16[4,64,192], index: 2, kind: input, shape index: {}]   ;;  %s5908_s3 = inlined_call_operand.vmem [shape: bf16[4,64,64], index: 3, kind: input, shape index: {}]   ;;  %s5909_s4 = inlined_call_operand.vmem [shape: bf16[4,64,2048], index: 4, kind: input, shape index: {}]   ;;  %s5910_s5 = inlined_call_operand.vmem [shape: f32[4,1,2048], index: 5, kind: input, shape index: {}]   ;;  %s5911_s6 = inlined_call_operand.vmem [shape: bf16[4,2048,64], index: 6, kind: input, shape index: {}]   ;;  %s5912_s7 = inlined_call_operand.vmem [shape: f32[4,16,64], index: 7, kind: input, shape index: {}]   ;;  %s5913_s8 = inlined_call_operand.hbm [shape: f32[2,8,64], index: 8, kind: output, shape index: {}]  }
   0x1 LB: > { %s5295_s28 = sadd.s32 4294967295, %s5229_s27   ;;  %p4396_p0 = scmp.ge.s32.totalorder %s5229_s27, 1  ;;  %s5229_s27 = sphi %s5289_s27, %s19_s27  }
   0x2   : > { %p307_p1 = scmp.lt.s32.totalorder %s5229_s27, 5 }
   0x4   : > { %p308_p2 = pnand %p4396_p0, %p307_p1 }
   0x5   : > { %p360_p3 = scmp.lt.s32.totalorder (!%p308_p2), %s5295_s28, 3  ;;  %p4408_p4 = scmp.ne.s32.totalorder (!%p308_p2), %s5295_s28, 0 }
   0x6   : > { %311 = sbr.rel (%p308_p2) target bundleno = 4248 (0x1098), region = 52 }
   0xd   : > { %s361_s29 = scalar_select %p360_p3, %s5295_s28, 3 }
   0xe   : > { %393 = sbr.rel (%p4408_p4) target bundleno = 21 (0x15), region = 56  ;;  %v394_v0 = vld [vmem:[%s5905_s0] sm:$0xff] (!%p4408_p4)  ;;  %vm396_vm0 = vcmask (!%p4408_p4), 523264   ;;  %v395_v1 = vld [vmem:[%s5905_s0 + $0x8] sm:$0xff] (!%p4408_p4) }
   0xf   : > { %s4653_s30 = sshll.u32 %s361_s29, 6  ;;  %s4654_s9 = sshll.u32 %s361_s29, 5  ;;  %397 = vst.msk [vmem:[#allocation2] sm:$0xff] (!%p4408_p4), %vm396_vm0, %v394_v0  ;;  %398 = vst.msk [vmem:[#allocation2 + $0x8] sm:$0xff] (!%p4408_p4), %vm396_vm0, %v395_v1 }
  0x10   : > { %s5304_s12 = scalar_lea.vmem %s5907_s2, %s4653_s30  ;;  %s5309_s15 = scalar_lea.vmem %s5908_s3, %s4654_s9 }
  0x11   : > { %s4655_s16 = sshll.u32 %s361_s29, 9  ;;  %s4403_s17 = sshll.u32 %s361_s29, 4 }
  0x12   : > { %s5314_s20 = scalar_lea.vmem %s5909_s4, %s4655_s16  ;;  %s5319_s23 = scalar_lea.vmem %s5910_s5, %s4403_s17 }
  0x13   : > { %s4656_s24 = sshll.u32 %s361_s29, 10  ;;  %s5324_s30 = scalar_lea.vmem %s5912_s7, %s4403_s17 }
  0x14   : > { %s5329_s11 = scalar_lea.vmem %s5911_s6, %s4656_s24 }
  0x15 PF: > { %v5005_v2 = vld [vmem:[%s5304_s12 + $0x4] ss:$8 sps:$4 sm:$0xff]   ;;  %v831_v3 = vlaneseq  ;;  %v5007_v4 = vld [vmem:[%s5304_s12] ss:$8 sps:$4 sm:$0xff]   ;;  %v5231_v5 = vmov 0   ;;  %vm784_vm1 = vcmask 523264  }
  0x16   : > { %820 = vmatprep.mubr.bf16.mxu0 %v5231_v5  ;;  %788 = vmatprep.subr.bf16.mxu0 %v5005_v2  ;;  %v5008_v6 = vld [vmem:[%s5304_s12 + $0x14] ss:$8 sps:$4 sm:$0xff]   ;;  %v5010_v8 = vld [vmem:[%s5304_s12 + $0x10] ss:$8 sps:$4 sm:$0xff]   ;;  %v5011_v9 = vld [vmem:[%s5304_s12 + $0x24] ss:$8 sps:$4 sm:$0xff]  }
  0x17   : > { %v5342_v7 = vshrl.u32 %v831_v3, 7  ;;  %789 = vmatpush1.bf16.msra.mxu0 %v5007_v4  ;;  %v5013_v11 = vld [vmem:[%s5304_s12 + $0x20] ss:$8 sps:$4 sm:$0xff]   ;;  %v5014_v12 = vld [vmem:[%s5304_s12 + $0x34] ss:$8 sps:$4 sm:$0xff]   ;;  %s5232_s17 = smov 64  }
  0x18   : > { %790 = vmatprep.subr.bf16.mxu0 %v5008_v6  ;;  %v741_v13 = vld [vmem:[%s5324_s30] sm:$0xff]  ;;  %v5016_v15 = vld [vmem:[%s5304_s12 + $0x30] ss:$8 sps:$4 sm:$0xff]   ;;  %v400_v17 = vld [vmem:[#allocation2 + $0x8] sm:$0xff]  ;;  %v5233_v19 = vmov 0.0   ;;  %vm5234_vm2 = vmmov 0  }
  0x19   : > { %v5347_v10 = vsub.s32 1, %v5342_v7  ;;  %v399_v16 = vld [vmem:[#allocation2] sm:$0xff]  ;;  %4876 = vmatprep.subr.mxu1 %v5233_v19  ;;  %4878 = vmatprep.mubr.msk.f32.mxu1 %vm5234_vm2, %v5233_v19  ;;  %v5362_v21 = vsub.s32 2, %v5342_v7  ;;  %v5374_v30 = vsub.s32 0, %v5342_v7  ;;  %vm856_vm3 = vcmask 130048   ;;  %s5235_s22 = smov 48  }
  0x1a   : > { %v743_v18 = vpack.c.bf16 %v400_v17, %v399_v16  ;;  %v5400_v38 = vld [vmem:[%s5906_s1] ss:$0 sm:$0xff]  ;;  %vm1026_vm4 = vcmask 64512   ;;  %v5405_v42 = vld [vmem:[%s5906_s1 + $0x1] ss:$0 sm:$0xff]  ;;  %s5236_s24 = smov 112  }
  0x1b   : > { %791 = vmatpush1.bf16.msra.mxu0 %v5010_v8  ;;  %v840_v14 = vrot.slane %v741_v13, %v5347_v10  ;;  %v850_v25 = vrot.slane %v741_v13, %v5362_v21  ;;  %v834_v31 = vrot.slane %v741_v13, %v5374_v30  ;;  %s5237_s25 = smov 32   ;;  %s5238_s26 = smov 96   ;;  %vm2225_vm5 = vcmask 261120  }
  0x1c   : > { %792 = vmatprep.subr.bf16.mxu0 %v5011_v9  ;;  %s5239_s9 = smov 16   ;;  %s5240_s10 = smov 80   ;;  %vm2228_vm6 = vcmask 392192  }
  0x1d   : > { %842 = vrot.lane.b32.xlu0 %v840_v14, %s5232_s17  ;;  %p4967_p5 = scmp.eq.s32.totalorder %s5295_s28, 3 }
  0x1f   : > { %793 = vmatpush1.bf16.msra.mxu0 %v5013_v11 }
  0x20   : > { %794 = vmatprep.subr.bf16.mxu0 %v5014_v12 }
  0x23   : > { %795 = vmatpush1.bf16.msra.mxu0 %v5016_v15 }
  0x24   : > { %4871 = vmatprep.subr.mxu0 %v5233_v19 }
  0x26   : > { %4417 = vmatmul.mubr.msk.bf16.vlgmr.msra.gmra.mrb[0].mxu0 %vm784_vm1, %v743_v18 }
  0x27   : > { %4873 = vmatprep.mubr.msk.f32.mxu0 %vm5234_vm2, %v5233_v19 }
  0x8f   : > { %v843_v20 = vpop.permute.xlu0 %842 }
  0xf9   : > { %v822_v22 = vpop.f32.mrb[0].mxu0 }
  0xfa   : > { %v5364_v23 = vadd.f32 %v843_v20, %v822_v22  ;;  %v824_v24 = vpop.f32.mrb[1].mxu0  ;;  %v5378_v33 = vadd.f32 %v834_v31, %v822_v22 }
  0xfb   : > { %v826_v26 = vpop.f32.mrb[2].mxu0  ;;  %v5387_v36 = vadd.f32 %v850_v25, %v824_v24 }
  0xfc   : > { %v5367_v27 = vadd.f32 %v843_v20, %v826_v26  ;;  %854 = vrot.lane.b32.xlu0 %v5364_v23, %s5232_s17  ;;  %v828_v28 = vpop.f32.mrb[3].mxu0  ;;  %v5382_v35 = vadd.f32 %v834_v31, %v826_v26 }
  0xfd   : > { %v5370_v29 = vadd.f32 %v850_v25, %v828_v28 }
  0xfe   : > { %933 = vrot.lane.b32.xlu1 %v5367_v27, %s5232_s17 }
 0x16e   : > { %v855_v32 = vpop.permute.xlu0 %854 }
 0x16f   : > { %4872 = vmatpush3.xpose.msk.msra.mxu0 %vm856_vm3, %v855_v32 }
 0x170   : > { %v934_v34 = vpop.permute.xlu1 %933  ;;  %4896 = vmatprep.subr.mxu0 %v5233_v19 }
 0x171   : > { %4877 = vmatpush3.xpose.msk.msra.mxu1 %vm856_vm3, %v934_v34 }
 0x172   : > { %4874 = vmatmul.mubr.msk.f32.vlgmr.msra.gmra.mrb[4].mxu0 %vm856_vm3, %v5378_v33  ;;  %4881 = vmatprep.subr.mxu1 %v5233_v19 }
 0x173   : > { %4898 = vmatprep.mubr.msk.f32.mxu0 %vm5234_vm2, %v5233_v19 }
 0x174   : > { %4879 = vmatmul.mubr.msk.f32.vlgmr.msra.gmra.mrb[0].mxu1 %vm856_vm3, %v5382_v35 }
 0x175   : > { %4882 = vmatpush3.msra.mxu1 %v5387_v36  ;;  %4883 = vmatprep.mubr.msk.f32.mxu1 %vm5234_vm2, %v5233_v19 }
 0x176   : > { %4886 = vmatprep.subr.mxu1 %v5233_v19 }
 0x245   : > { %v928_v37 = vpop.f32.mrb[4].mxu0 }
 0x246   : > { %v1010_v39 = vmul.f32 0.25, %v928_v37  ;;  %v4875_v40 = vpop.f32.mrb[5].mxu0 }
 0x247   : > { %v1006_v41 = vpop.f32.mrb[0].mxu1 }
 0x248   : > { %v1011_v43 = vmul.f32 0.25, %v1006_v41  ;;  %v4880_v44 = vpop.f32.mrb[1].mxu1  ;;  %v1024_v45 = vadd.f32 %v5400_v38, %v1010_v39 }
 0x24a   : > { %v1027_v46 = vsel %vm1026_vm4, %v1024_v45, -inf  ;;  %v1025_v47 = vadd.f32 %v5405_v42, %v1011_v43 }
 0x24b   : > { %1028 = vmax.xlane.f32.xlu1 %v1027_v46 }
 0x24c   : > { %v1030_v48 = vsel %vm1026_vm4, %v1025_v47, -inf }
 0x24d   : > { %1031 = vmax.xlane.f32.xlu0 %v1030_v48 }
 0x25c   : > { %1275 = vrot.lane.b32.xlu1 %v5367_v27, %s5235_s22 }
 0x2d8   : > { %v1029_v49 = vpop.xlane.xlu1 %1028 }
 0x2d9   : > { %v1033_v50 = vsub.f32 %v1024_v45, %v1029_v49 }
 0x2da   : > { %v1032_v51 = vpop.xlane.xlu0 %1031 }
 0x2db   : > { %v1035_v52 = vmul.f32 1.442695, %v1033_v50  ;;  %v1034_v53 = vsub.f32 %v1025_v47, %v1032_v51 }
 0x2dc   : > { %v1276_v54 = vpop.permute.xlu1 %1275 }
 0x2dd   : > { %5149 = vpow2.f32 %v1035_v52  ;;  %v1037_v55 = vmul.f32 1.442695, %v1034_v53  ;;  %4897 = vmatpush3.xpose.msk.msra.mxu0 %vm856_vm3, %v1276_v54 }
 0x2de   : > { %4906 = vmatprep.subr.mxu0 %v5233_v19 }
 0x2df   : > { %5151 = vpow2.f32 %v1037_v55 }
 0x2e7   : > { %v5150_v56 = vpop.eup %5149 }
 0x2e8   : > { %v1039_v57 = vsel %vm1026_vm4, %v5150_v56, 0.0 }
 0x2e9   : > { %v5152_v58 = vpop.eup %5151  ;;  %1040 = vadd.xlane.f32.xlu0 %v1039_v57 }
 0x2ea   : > { %v1042_v59 = vsel %vm1026_vm4, %v5152_v58, 0.0 }
 0x2eb   : > { %1043 = vadd.xlane.f32.xlu1 %v1042_v59 }
 0x2fc   : > { %1195 = vrot.lane.b32.xlu1 %v5378_v33, %s5236_s24 }
 0x2ff   : > { %1197 = vrot.lane.b32.xlu0 %v5364_v23, %s5235_s22 }
 0x303   : > { %1273 = vrot.lane.b32.xlu0 %v5382_v35, %s5236_s24 }
 0x376   : > { %v1041_v60 = vpop.xlane.xlu0 %1040 }
 0x377   : > { %5153 = vrcp.f32 %v1041_v60 }
 0x378   : > { %v1044_v61 = vpop.xlane.xlu1 %1043 }
 0x379   : > { %5155 = vrcp.f32 %v1044_v61 }
 0x37a   : > { %v1198_v62 = vpop.permute.xlu0 %1197 }
 0x37c   : > { %v1196_v4 = vpop.permute.xlu1 %1195 }
 0x37e   : > { %v1274_v63 = vpop.permute.xlu0 %1273 }
 0x37f   : > { %4899 = vmatmul.mubr.msk.f32.vlgmr.msra.gmra.mrb[6].mxu0 %vm856_vm3, %v1274_v63 }
 0x380   : > { %4908 = vmatprep.mubr.msk.f32.mxu0 %vm5234_vm2, %v5233_v19 }
 0x381   : > { %v5154_v0 = vpop.eup %5153 }
 0x382   : > { %v1047_v1 = vmul.f32 %v5154_v0, %v5150_v56 }
 0x383   : > { %v5156_v2 = vpop.eup %5155 }
 0x384   : > { %4884 = vmatmul.mubr.msk.f32.vlgmr.msra.gmra.mrb[2].mxu1 %vm1026_vm4, %v1047_v1  ;;  %v1048_v3 = vmul.f32 %v5156_v2, %v5152_v58 }
 0x385   : > { %4887 = vmatpush3.msra.mxu1 %v5370_v29  ;;  %4888 = vmatprep.mubr.msk.f32.mxu1 %vm5234_vm2, %v5233_v19 }
 0x386   : > { %4891 = vmatprep.subr.mxu1 %v5233_v19 }
 0x388   : > { %4889 = vmatmul.mubr.msk.f32.vlgmr.msra.gmra.mrb[4].mxu1 %vm1026_vm4, %v1048_v3 }
 0x389   : > { %4893 = vmatprep.mubr.msk.f32.mxu1 %vm5234_vm2, %v5233_v19 }
 0x38c   : > { %4892 = vmatpush3.xpose.msk.msra.mxu1 %vm856_vm3, %v1198_v62 }
 0x38d   : > { %4901 = vmatprep.subr.mxu1 %v5233_v19 }
 0x38f   : > { %4894 = vmatmul.mubr.msk.f32.vlgmr.msra.gmra.mrb[6].mxu1 %vm856_vm3, %v1196_v4 }
 0x390   : > { %4903 = vmatprep.mubr.msk.f32.mxu1 %vm5234_vm2, %v5233_v19 }
 0x452   : > { %v1347_v6 = vpop.f32.mrb[6].mxu0 }
 0x453   : > { %v1352_v8 = vmul.f32 0.25, %v1347_v6  ;;  %v4900_v9 = vpop.f32.mrb[7].mxu0 }
 0x455   : > { %v1354_v11 = vadd.f32 %v5405_v42, %v1352_v8 }
 0x457   : > { %v5440_v12 = vpop.f32.mrb[2].mxu1  ;;  %v1358_v13 = vsel %vm1026_vm4, %v1354_v11, -inf }
 0x458   : > { %v4885_v14 = vpop.f32.mrb[3].mxu1  ;;  %1359 = vmax.xlane.f32.xlu0 %v1358_v13 }
 0x45b   : > { %v5443_v15 = vpop.f32.mrb[4].mxu1 }
 0x45c   : > { %v4890_v16 = vpop.f32.mrb[5].mxu1 }
 0x462   : > { %v1269_v17 = vpop.f32.mrb[6].mxu1 }
 0x463   : > { %v1351_v18 = vmul.f32 0.25, %v1269_v17  ;;  %v4895_v20 = vpop.f32.mrb[7].mxu1 }
 0x465   : > { %v1353_v22 = vadd.f32 %v5400_v38, %v1351_v18 }
 0x467   : > { %v1355_v24 = vsel %vm1026_vm4, %v1353_v22, -inf }
 0x468   : > { %1356 = vmax.xlane.f32.xlu1 %v1355_v24 }
 0x46e   : > { %1378 = vrot.lane.b32.xlu0 %v5387_v36, %s5236_s24 }
 0x472   : > { %1611 = vrot.lane.b32.xlu0 %v5367_v27, %s5237_s25 }
 0x4e5   : > { %v1360_v25 = vpop.xlane.xlu0 %1359 }
 0x4e6   : > { %v1362_v26 = vsub.f32 %v1354_v11, %v1360_v25 }
 0x4e8   : > { %v1365_v28 = vmul.f32 1.442695, %v1362_v26 }
 0x4e9   : > { %v1379_v31 = vpop.permute.xlu0 %1378 }
 0x4ea   : > { %5157 = vpow2.f32 %v1365_v28  ;;  %4902 = vmatpush3.msra.mxu1 %v1379_v31 }
 0x4eb   : > { %4911 = vmatprep.subr.mxu1 %v5233_v19 }
 0x4ed   : > { %v1612_v47 = vpop.permute.xlu0 %1611 }
 0x4f4   : > { %v5158_v32 = vpop.eup %5157 }
 0x4f5   : > { %v1357_v34 = vpop.xlane.xlu1 %1356  ;;  %v1370_v37 = vsel %vm1026_vm4, %v5158_v32, 0.0 }
 0x4f6   : > { %v1361_v39 = vsub.f32 %v1353_v22, %v1357_v34  ;;  %1371 = vadd.xlane.f32.xlu1 %v1370_v37 }
 0x4f8   : > { %v1363_v40 = vmul.f32 1.442695, %v1361_v39 }
 0x4fa   : > { %5159 = vpow2.f32 %v1363_v40 }
 0x504   : > { %v5160_v41 = vpop.eup %5159 }
 0x505   : > { %v1367_v43 = vsel %vm1026_vm4, %v5160_v41, 0.0 }
 0x506   : > { %1368 = vadd.xlane.f32.xlu0 %v1367_v43 }
 0x507   : > { %1455 = vrot.lane.b32.xlu1 %v5370_v29, %s5236_s24 }
 0x50b   : > { %1533 = vrot.lane.b32.xlu1 %v5364_v23, %s5237_s25 }
 0x50f   : > { %1531 = vrot.lane.b32.xlu1 %v5378_v33, %s5238_s26 }
 0x51c   : > { %1609 = vrot.lane.b32.xlu0 %v5382_v35, %s5238_s26 }
 0x583   : > { %v1372_v44 = vpop.xlane.xlu1 %1371 }
 0x584   : > { %5161 = vrcp.f32 %v1372_v44 }
 0x587   : > { %v1456_v45 = vpop.permute.xlu1 %1455 }
 0x588   : > { %4907 = vmatpush3.msra.mxu0 %v1456_v45 }
 0x589   : > { %4916 = vmatprep.subr.mxu0 %v5233_v19 }
 0x58b   : > { %v1534_v52 = vpop.permute.xlu1 %1533 }
 0x58e   : > { %v5162_v46 = vpop.eup %5161 }
 0x58f   : > { %v1376_v48 = vmul.f32 %v5162_v46, %v5158_v32  ;;  %v1532_v54 = vpop.permute.xlu1 %1531 }
 0x591   : > { %4909 = vmatmul.mubr.msk.f32.vlgmr.msra.gmra.mrb[8].mxu0 %vm1026_vm4, %v1376_v48 }
 0x592   : > { %4917 = vmatpush3.xpose.msk.msra.mxu0 %vm856_vm3, %v1612_v47  ;;  %4918 = vmatprep.mubr.msk.f32.mxu0 %vm5234_vm2, %v5233_v19 }
 0x593   : > { %v1369_v49 = vpop.xlane.xlu0 %1368  ;;  %4926 = vmatprep.subr.mxu0 %v5233_v19 }
 0x594   : > { %5163 = vrcp.f32 %v1369_v49 }
 0x597   : > { %v1610_v50 = vpop.permute.xlu0 %1609 }
 0x598   : > { %4919 = vmatmul.mubr.msk.f32.vlgmr.msra.gmra.mrb[10].mxu0 %vm856_vm3, %v1610_v50 }
 0x599   : > { %4928 = vmatprep.mubr.msk.f32.mxu0 %vm5234_vm2, %v5233_v19 }
 0x59e   : > { %v5164_v51 = vpop.eup %5163 }
 0x59f   : > { %v1375_v53 = vmul.f32 %v5164_v51, %v5160_v41 }
 0x5a1   : > { %4904 = vmatmul.mubr.msk.f32.vlgmr.msra.gmra.mrb[8].mxu1 %vm1026_vm4, %v1375_v53 }
 0x5a2   : > { %4912 = vmatpush3.xpose.msk.msra.mxu1 %vm856_vm3, %v1534_v52  ;;  %4913 = vmatprep.mubr.msk.f32.mxu1 %vm5234_vm2, %v5233_v19 }
 0x5a3   : > { %4921 = vmatprep.subr.mxu1 %v5233_v19 }
 0x5a5   : > { %4914 = vmatmul.mubr.msk.f32.vlgmr.msra.gmra.mrb[10].mxu1 %vm856_vm3, %v1532_v54 }
 0x5a6   : > { %4923 = vmatprep.mubr.msk.f32.mxu1 %vm5234_vm2, %v5233_v19 }
 0x664   : > { %v5479_v55 = vpop.f32.mrb[8].mxu0 }
 0x665   : > { %v4910_v56 = vpop.f32.mrb[9].mxu0 }
 0x66b   : > { %v1683_v57 = vpop.f32.mrb[10].mxu0 }
 0x66c   : > { %v1688_v58 = vmul.f32 0.25, %v1683_v57  ;;  %v4920_v59 = vpop.f32.mrb[11].mxu0 }
 0x66e   : > { %v1690_v60 = vadd.f32 %v5405_v42, %v1688_v58 }
 0x670   : > { %v1694_v61 = vsel %vm1026_vm4, %v1690_v60, -inf }
 0x671   : > { %1695 = vmax.xlane.f32.xlu0 %v1694_v61 }
 0x674   : > { %v5483_v62 = vpop.f32.mrb[8].mxu1 }
 0x675   : > { %v4990_v63 = vpack.i.bf16 %v5479_v55, %v5483_v62  ;;  %v4905_v0 = vpop.f32.mrb[9].mxu1  ;;  %v5017_v62 = vld [vmem:[%s5309_s15] sm:$0xff]  }
 0x678   : > { %v1605_v1 = vpop.f32.mrb[10].mxu1 }
 0x679   : > { %v1687_v2 = vmul.f32 0.25, %v1605_v1  ;;  %v4915_v3 = vpop.f32.mrb[11].mxu1 }
 0x67b   : > { %v1689_v4 = vadd.f32 %v5400_v38, %v1687_v2 }
 0x67d   : > { %v1691_v6 = vsel %vm1026_vm4, %v1689_v4, -inf }
 0x67e   : > { %1692 = vmax.xlane.f32.xlu1 %v1691_v6 }
 0x687   : > { %1713 = vrot.lane.b32.xlu0 %v5387_v36, %s5238_s26 }
 0x68b   : > { %1945 = vrot.lane.b32.xlu0 %v5367_v27, %s5239_s9 }
 0x6fe   : > { %v1696_v8 = vpop.xlane.xlu0 %1695 }
 0x6ff   : > { %v1698_v9 = vsub.f32 %v1690_v60, %v1696_v8 }
 0x701   : > { %v1701_v11 = vmul.f32 1.442695, %v1698_v9  ;;  %v5019_v9 = vld [vmem:[%s5309_s15 + $0x10] sm:$0xff]  }
 0x702   : > { %v1714_v13 = vpop.permute.xlu0 %1713 }
 0x703   : > { %5165 = vpow2.f32 %v1701_v11  ;;  %4922 = vmatpush3.msra.mxu1 %v1714_v13 }
 0x704   : > { %4931 = vmatprep.subr.mxu1 %v5233_v19 }
 0x706   : > { %v1946_v26 = vpop.permute.xlu0 %1945 }
 0x70b   : > { %v1693_v14 = vpop.xlane.xlu1 %1692 }
 0x70c   : > { %v1697_v16 = vsub.f32 %v1689_v4, %v1693_v14  ;;  %v5020_v14 = vld [vmem:[%s5309_s15 + $0x18] sm:$0xff]  }
 0x70d   : > { %v5166_v17 = vpop.eup %5165 }
 0x70e   : > { %v1699_v18 = vmul.f32 1.442695, %v1697_v16  ;;  %v1706_v20 = vsel %vm1026_vm4, %v5166_v17, 0.0 }
 0x70f   : > { %1707 = vadd.xlane.f32.xlu1 %v1706_v20 }
 0x710   : > { %5167 = vpow2.f32 %v1699_v18 }
 0x71a   : > { %v5168_v22 = vpop.eup %5167 }
 0x71b   : > { %v1703_v24 = vsel %vm1026_vm4, %v5168_v22, 0.0 }
 0x71c   : > { %1704 = vadd.xlane.f32.xlu0 %v1703_v24 }
 0x720   : > { %1789 = vrot.lane.b32.xlu1 %v5370_v29, %s5238_s26 }
 0x724   : > { %1867 = vrot.lane.b32.xlu1 %v5364_v23, %s5239_s9 }
 0x728   : > { %1865 = vrot.lane.b32.xlu1 %v5378_v33, %s5240_s10 }
 0x732   : > { %1943 = vrot.lane.b32.xlu0 %v5382_v35, %s5240_s10 }
 0x79c   : > { %v1708_v27 = vpop.xlane.xlu1 %1707 }
 0x79d   : > { %5169 = vrcp.f32 %v1708_v27 }
 0x7a0   : > { %v1790_v25 = vpop.permute.xlu1 %1789 }
 0x7a1   : > { %4927 = vmatpush3.msra.mxu0 %v1790_v25 }
 0x7a2   : > { %4936 = vmatprep.subr.mxu0 %v5233_v19 }
 0x7a4   : > { %v1868_v35 = vpop.permute.xlu1 %1867 }
 0x7a7   : > { %v5170_v28 = vpop.eup %5169 }
 0x7a8   : > { %v1712_v31 = vmul.f32 %v5170_v28, %v5166_v17  ;;  %v1866_v37 = vpop.permute.xlu1 %1865 }
 0x7a9   : > { %v1705_v32 = vpop.xlane.xlu0 %1704 }
 0x7aa   : > { %5171 = vrcp.f32 %v1705_v32  ;;  %4929 = vmatmul.mubr.msk.f32.vlgmr.msra.gmra.mrb[12].mxu0 %vm1026_vm4, %v1712_v31 }
 0x7ab   : > { %4937 = vmatpush3.xpose.msk.msra.mxu0 %vm856_vm3, %v1946_v26  ;;  %4938 = vmatprep.mubr.msk.f32.mxu0 %vm5234_vm2, %v5233_v19 }
 0x7ac   : > { %4946 = vmatprep.subr.mxu0 %v5233_v19 }
 0x7ad   : > { %v1944_v23 = vpop.permute.xlu0 %1943 }
 0x7ae   : > { %4939 = vmatmul.mubr.msk.f32.vlgmr.msra.gmra.mrb[14].mxu0 %vm856_vm3, %v1944_v23 }
 0x7af   : > { %4948 = vmatprep.mubr.msk.f32.mxu0 %vm5234_vm2, %v5233_v19 }
 0x7b4   : > { %v5172_v33 = vpop.eup %5171 }
 0x7b5   : > { %v1711_v34 = vmul.f32 %v5172_v33, %v5168_v22 }
 0x7b7   : > { %4924 = vmatmul.mubr.msk.f32.vlgmr.msra.gmra.mrb[12].mxu1 %vm1026_vm4, %v1711_v34 }
 0x7b8   : > { %4932 = vmatpush3.xpose.msk.msra.mxu1 %vm856_vm3, %v1868_v35  ;;  %4933 = vmatprep.mubr.msk.f32.mxu1 %vm5234_vm2, %v5233_v19 }
 0x7b9   : > { %4941 = vmatprep.subr.mxu1 %v5233_v19 }
 0x7bb   : > { %4934 = vmatmul.mubr.msk.f32.vlgmr.msra.gmra.mrb[14].mxu1 %vm856_vm3, %v1866_v37 }
 0x7bc   : > { %4943 = vmatprep.mubr.msk.f32.mxu1 %vm5234_vm2, %v5233_v19 }
 0x87d   : > { %v1861_v39 = vpop.f32.mrb[12].mxu0 }
 0x87e   : > { %v4930_v40 = vpop.f32.mrb[13].mxu0 }
 0x87f   : > { %v5557_v40 = vsub.s32 3, %v5342_v7 }
 0x881   : > { %v2017_v41 = vpop.f32.mrb[14].mxu0 }
 0x882   : > { %v2022_v43 = vmul.f32 0.25, %v2017_v41  ;;  %v4940_v44 = vpop.f32.mrb[15].mxu0  ;;  %v5560_v41 = vld [vmem:[%s5324_s30] sm:$0xff] }
 0x884   : > { %v2024_v45 = vadd.f32 %v5405_v42, %v2022_v43 }
 0x886   : > { %v2028_v46 = vsel %vm1026_vm4, %v2024_v45, -inf }
 0x887   : > { %2029 = vmax.xlane.f32.xlu0 %v2028_v46 }
 0x88a   : > { %v1785_v47 = vpop.f32.mrb[12].mxu1 }
 0x88b   : > { %v4995_v48 = vpack.i.bf16 %v1861_v39, %v1785_v47  ;;  %v4925_v49 = vpop.f32.mrb[13].mxu1 }
 0x88e   : > { %v1939_v50 = vpop.f32.mrb[14].mxu1 }
 0x88f   : > { %v2021_v51 = vmul.f32 0.25, %v1939_v50  ;;  %v4935_v52 = vpop.f32.mrb[15].mxu1 }
 0x891   : > { %v2023_v53 = vadd.f32 %v5400_v38, %v2021_v51  ;;  %v5191_v51 = vld [vmem:[#allocation2 + $0x8] sm:$0xff] }
 0x893   : > { %v2025_v54 = vsel %vm1026_vm4, %v2023_v53, -inf }
 0x894   : > { %2026 = vmax.xlane.f32.xlu1 %v2025_v54 }
 0x914   : > { %v2030_v56 = vpop.xlane.xlu0 %2029 }
 0x915   : > { %v2032_v57 = vsub.f32 %v2024_v45, %v2030_v56 }
 0x917   : > { %v2035_v58 = vmul.f32 1.442695, %v2032_v57 }
 0x919   : > { %5173 = vpow2.f32 %v2035_v58 }
 0x921   : > { %v2027_v59 = vpop.xlane.xlu1 %2026 }
 0x922   : > { %v2031_v42 = vsub.f32 %v2023_v53, %v2027_v59 }
 0x923   : > { %v5174_v60 = vpop.eup %5173 }
 0x924   : > { %v2033_v61 = vmul.f32 1.442695, %v2031_v42  ;;  %v2040_v0 = vsel %vm1026_vm4, %v5174_v60, 0.0 }
 0x925   : > { %2041 = vadd.xlane.f32.xlu1 %v2040_v0 }
 0x926   : > { %5175 = vpow2.f32 %v2033_v61 }
 0x930   : > { %v5176_v1 = vpop.eup %5175 }
 0x931   : > { %v2037_v2 = vsel %vm1026_vm4, %v5176_v1, 0.0 }
 0x932   : > { %2038 = vadd.xlane.f32.xlu0 %v2037_v2  ;;  %v419_v2 = vld [vmem:[%s5314_s20] sm:$0xff] }
 0x936   : > { %2123 = vrot.lane.b32.xlu1 %v5370_v29, %s5240_s10 }
 0x93a   : > { %4991 = vrot.lane.b32.xlu1 %v4990_v63, %s5239_s9  ;;  %v5018_v63 = vld [vmem:[%s5309_s15 + $0x8] sm:$0xff]   ;;  %s5241_s15 = smov [#allocation2]  }
 0x948   : > { %2047 = vrot.lane.b32.xlu0 %v5387_v36, %s5240_s10 }
 0x94c   : > { %4996 = vrot.lane.b32.xlu0 %v4995_v48, %s5237_s25  ;;  %v5190_v48 = vld [vmem:[#allocation2] sm:$0xff] }
 0x9b2   : > { %v2042_v38 = vpop.xlane.xlu1 %2041 }
 0x9b3   : > { %5177 = vrcp.f32 %v2042_v38  ;;  %v427_v38 = vld [vmem:[%s5314_s20 + $0x40] sm:$0xff] }
 0x9b6   : > { %v2124_v3 = vpop.permute.xlu1 %2123 }
 0x9b7   : > { %4947 = vmatpush3.msra.mxu0 %v2124_v3  ;;  %v420_v3 = vld [vmem:[%s5314_s20 + $0x8] sm:$0xff] }
 0x9ba   : > { %v4992_v20 = vpop.permute.xlu1 %4991 }
 0x9bb   : > { %v4994_v24 = vunpack.i.h.bf16 %v4992_v20  ;;  %v4993_v27 = vunpack.i.l.bf16 %v4992_v20  ;;  %v452_v20 = vld [vmem:[%s5314_s20 + $0x108] sm:$0xff] }
 0x9bd   : > { %v5178_v4 = vpop.eup %5177  ;;  %v2223_v31 = vsel %vm856_vm3, %v5440_v12, %v4993_v27 }
 0x9be   : > { %v2046_v6 = vmul.f32 %v5178_v4, %v5174_v60  ;;  %v4450_v4 = vcombine.high %v419_v2, %v427_v38 }
 0x9bf   : > { %v2039_v8 = vpop.xlane.xlu0 %2038 }
 0x9c0   : > { %5179 = vrcp.f32 %v2039_v8  ;;  %4949 = vmatmul.mubr.msk.f32.vlgmr.msra.gmra.mrb[16].mxu0 %vm1026_vm4, %v2046_v6  ;;  %v428_v6 = vld [vmem:[%s5314_s20 + $0x48] sm:$0xff]  ;;  %v4449_v8 = vcombine.low %v419_v2, %v427_v38  ;;  %2751 = vmatprep.subr.bf16.mxu0 %v4450_v4  ;;  %v437_v38 = vld [vmem:[%s5314_s20 + $0x90] sm:$0xff]  ;;  %v438_v4 = vld [vmem:[%s5314_s20 + $0x98] sm:$0xff] }
 0x9c1   : > { %2783 = vmatprep.mubr.bf16.mxu0 %v5231_v5 }
 0x9c2   : > { %2752 = vmatpush1.bf16.msra.mxu0 %v4449_v8 }
 0x9c3   : > { %v2048_v29 = vpop.permute.xlu0 %2047 }
 0x9c4   : > { %4942 = vmatpush3.msra.mxu1 %v2048_v29  ;;  %v4451_v29 = vcombine.low %v420_v3, %v428_v6 }
 0x9c5   : > { %4951 = vmatprep.subr.bf16.mxu1 %v5233_v19 }
 0x9c7   : > { %v4997_v22 = vpop.permute.xlu0 %4996 }
 0x9c8   : > { %v4999_v25 = vunpack.i.h.bf16 %v4997_v22  ;;  %v4998_v26 = vunpack.i.l.bf16 %v4997_v22 }
 0x9ca   : > { %v5180_v36 = vpop.eup %5179  ;;  %v2226_v33 = vsel %vm2225_vm5, %v2223_v31, %v4998_v26  ;;  %v468_v31 = vld [vmem:[%s5314_s20 + $0x188] sm:$0xff] }
 0x9cb   : > { %v2045_v55 = vmul.f32 %v5180_v36, %v5176_v1  ;;  %v4452_v36 = vcombine.high %v420_v3, %v428_v6  ;;  %v445_v3 = vld [vmem:[%s5314_s20 + $0xd0] sm:$0xff]  ;;  %v446_v6 = vld [vmem:[%s5314_s20 + $0xd8] sm:$0xff] }
 0x9cd   : > { %4944 = vmatmul.mubr.msk.f32.vlgmr.msra.gmra.mrb[16].mxu1 %vm1026_vm4, %v2045_v55  ;;  %v435_v55 = vld [vmem:[%s5314_s20 + $0x80] sm:$0xff] }
 0x9ce   : > { %4959 = vmatprep.mubr.msk.bf16.mxu1 %vm5234_vm2, %v5233_v19  ;;  %4952 = vmatpush3.bf16.msra.mxu1 %v5017_v62  ;;  %v443_v62 = vld [vmem:[%s5314_s20 + $0xc0] sm:$0xff] }
 0x9cf   : > { %4953 = vmatprep.subr.bf16.mxu1 %v5233_v19 }
 0x9d2   : > { %4954 = vmatpush3.bf16.msra.mxu1 %v5018_v63  ;;  %v436_v63 = vld [vmem:[%s5314_s20 + $0x88] sm:$0xff] }
 0x9d3   : > { %4955 = vmatprep.subr.bf16.mxu1 %v5233_v19 }
 0x9d6   : > { %4956 = vmatpush3.bf16.msra.mxu1 %v5019_v9  ;;  %v4466_v9 = vcombine.high %v435_v55, %v443_v62 }
 0x9d7   : > { %4957 = vmatprep.subr.bf16.mxu1 %v5233_v19  ;;  %v2224_v19 = vsel %vm856_vm3, %v5443_v15, %v4994_v24  ;;  %v2235_v15 = vrot.slane %v5560_v41, %v5557_v40  ;;  %v460_v24 = vld [vmem:[%s5314_s20 + $0x148] sm:$0xff] }
 0x9d8   : > { %v2227_v35 = vsel %vm2225_vm5, %v2224_v19, %v4999_v25  ;;  %2753 = vmatprep.subr.bf16.mxu0 %v4466_v9  ;;  %v4483_v25 = vcombine.low %v452_v20, %v460_v24  ;;  %v4484_v26 = vcombine.high %v452_v20, %v460_v24  ;;  %v475_v19 = vld [vmem:[%s5314_s20 + $0x1c0] sm:$0xff]  ;;  %v4469_v9 = vcombine.low %v437_v38, %v445_v3  ;;  %v478_v20 = vld [vmem:[%s5314_s20 + $0x1d8] sm:$0xff] }
 0x9da   : > { %4958 = vmatpush3.bf16.msra.mxu1 %v5020_v14 }
 0x9db   : > { %2794 = vmatprep.subr.bf16.mxu1 %v4452_v36  ;;  %v4470_v36 = vcombine.high %v437_v38, %v445_v3  ;;  %v425_v3 = vld [vmem:[%s5314_s20 + $0x30] sm:$0xff] }
 0xa93   : > { %v2195_v11 = vpop.f32.mrb[16].mxu0 }
 0xa94   : > { %v4950_v13 = vpop.f32.mrb[17].mxu0 }
 0xa95   : > { %v4465_v13 = vcombine.low %v435_v55, %v443_v62  ;;  %v453_v55 = vld [vmem:[%s5314_s20 + $0x110] sm:$0xff]  ;;  %v454_v62 = vld [vmem:[%s5314_s20 + $0x118] sm:$0xff] }
 0xa97   : > { %2754 = vmatpush1.bf16.msra.mxu0 %v4465_v13 }
 0xaa0   : > { %v2119_v16 = vpop.f32.mrb[16].mxu1 }
 0xaa1   : > { %v5000_v17 = vpack.i.bf16 %v2195_v11, %v2119_v16  ;;  %v4945_v18 = vpop.f32.mrb[17].mxu1  ;;  %v444_v11 = vld [vmem:[%s5314_s20 + $0xc8] sm:$0xff] }
 0xaa2   : > { %v4467_v14 = vcombine.low %v436_v63, %v444_v11  ;;  %v4468_v16 = vcombine.high %v436_v63, %v444_v11  ;;  %v459_v18 = vld [vmem:[%s5314_s20 + $0x140] sm:$0xff]  ;;  %v462_v63 = vld [vmem:[%s5314_s20 + $0x158] sm:$0xff]  ;;  %v4471_v11 = vcombine.low %v438_v4, %v446_v6 }
 0xaa3   : > { %5001 = vrot.lane.b32.xlu1 %v5000_v17, %s5235_s22  ;;  %v451_v17 = vld [vmem:[%s5314_s20 + $0x100] sm:$0xff]  ;;  %v4487_v24 = vcombine.low %v454_v62, %v462_v63 }
 0xaa4   : > { %v4482_v22 = vcombine.high %v451_v17, %v459_v18  ;;  %v4481_v27 = vcombine.low %v451_v17, %v459_v18  ;;  %v477_v17 = vld [vmem:[%s5314_s20 + $0x1d0] sm:$0xff]  ;;  %v470_v18 = vld [vmem:[%s5314_s20 + $0x198] sm:$0xff] }
 0xaa6   : > { %2755 = vmatprep.subr.bf16.mxu0 %v4482_v22 }
 0xaa7   : > { %2756 = vmatpush1.bf16.msra.mxu0 %v4481_v27 }
 0xb15   : > { %v5002_v28 = vpop.permute.xlu1 %5001 }
 0xb16   : > { %v5004_v32 = vunpack.i.h.bf16 %v5002_v28  ;;  %v5003_v23 = vunpack.i.l.bf16 %v5002_v28  ;;  %v467_v28 = vld [vmem:[%s5314_s20 + $0x180] sm:$0xff] }
 0xb18   : > { %v2230_v34 = vsel %vm2228_vm6, %v2227_v35, %v5004_v32  ;;  %v2229_v37 = vsel %vm2228_vm6, %v2226_v33, %v5003_v23  ;;  %v4498_v32 = vcombine.high %v467_v28, %v475_v19  ;;  %v476_v23 = vld [vmem:[%s5314_s20 + $0x1c8] sm:$0xff]  ;;  %v4497_v33 = vcombine.low %v467_v28, %v475_v19  ;;  %v431_v28 = vld [vmem:[%s5314_s20 + $0x60] sm:$0xff] }
 0xb19   : > { %v2231_v39 = vpack.c.bf16 %v2230_v34, %v2229_v37  ;;  %v4499_v35 = vcombine.low %v468_v31, %v476_v23  ;;  %v4500_v34 = vcombine.high %v468_v31, %v476_v23  ;;  %v421_v37 = vld [vmem:[%s5314_s20 + $0x10] sm:$0xff]  ;;  %v424_v19 = vld [vmem:[%s5314_s20 + $0x28] sm:$0xff]  ;;  %v4503_v23 = vcombine.low %v470_v18, %v478_v20 }
 0xb1a   : > { %2757 = vmatprep.subr.bf16.mxu0 %v4498_v32  ;;  %v432_v31 = vld [vmem:[%s5314_s20 + $0x68] sm:$0xff] }
 0xb1b   : > { %4960 = vmatmul.mubr.msk.bf16.vlgmr.msra.gmra.mrb[20].mxu1 %vm784_vm1, %v2231_v39  ;;  %2758 = vmatpush1.bf16.msra.mxu0 %v4497_v33  ;;  %v429_v39 = vld [vmem:[%s5314_s20 + $0x50] sm:$0xff] }
 0xb1c   : > { %2826 = vmatprep.mubr.bf16.mxu1 %v5231_v5  ;;  %2795 = vmatpush1.bf16.msra.mxu1 %v4451_v29 }
 0xb1d   : > { %2796 = vmatprep.subr.bf16.mxu1 %v4468_v16  ;;  %v469_v16 = vld [vmem:[%s5314_s20 + $0x190] sm:$0xff] }
 0xb1e   : > { %v4502_v27 = vcombine.high %v469_v16, %v477_v17  ;;  %v4501_v32 = vcombine.low %v469_v16, %v477_v17 }
 0xb20   : > { %2797 = vmatpush1.bf16.msra.mxu1 %v4467_v14  ;;  %v4488_v14 = vcombine.high %v454_v62, %v462_v63  ;;  %v441_v63 = vld [vmem:[%s5314_s20 + $0xb0] sm:$0xff] }
 0xb21   : > { %2798 = vmatprep.subr.bf16.mxu1 %v4484_v26  ;;  %v423_v26 = vld [vmem:[%s5314_s20 + $0x20] sm:$0xff] }
 0xb22   : > { %v4458_v33 = vcombine.high %v423_v26, %v431_v28 }
 0xb24   : > { %2799 = vmatpush1.bf16.msra.mxu1 %v4483_v25  ;;  %v4504_v25 = vcombine.high %v470_v18, %v478_v20  ;;  %v457_v20 = vld [vmem:[%s5314_s20 + $0x130] sm:$0xff] }
 0xb25   : > { %2800 = vmatprep.subr.bf16.mxu1 %v4500_v34  ;;  %v439_v34 = vld [vmem:[%s5314_s20 + $0xa0] sm:$0xff] }
 0xb28   : > { %2801 = vmatpush1.bf16.msra.mxu1 %v4499_v35  ;;  %v4460_v35 = vcombine.high %v424_v19, %v432_v31 }
 0xbee   : > { %v2297_v12 = vpop.f32.mrb[20].mxu1 }
 0xbef   : > { %v2298_v43 = vadd.f32 %v2297_v12, %v2235_v15  ;;  %v4961_v44 = vpop.f32.mrb[21].mxu1  ;;  %v4453_v12 = vcombine.low %v421_v37, %v429_v39 }
 0xbf0   : > { %v2300_v45 = vpop.f32.mrb[22].mxu1  ;;  %v430_v44 = vld [vmem:[%s5314_s20 + $0x58] sm:$0xff] }
 0xbf1   : > { %v2301_v46 = vadd.f32 %v2300_v45, %v2235_v15  ;;  %v4962_v47 = vpop.f32.mrb[23].mxu1  ;;  %v2304_v49 = vadd.f32 %v5190_v48, %v2298_v43  ;;  %v422_v15 = vld [vmem:[%s5314_s20 + $0x18] sm:$0xff]  ;;  %v4454_v43 = vcombine.high %v421_v37, %v429_v39  ;;  %v447_v37 = vld [vmem:[%s5314_s20 + $0xe0] sm:$0xff]  ;;  %v440_v39 = vld [vmem:[%s5314_s20 + $0xa8] sm:$0xff] }
 0xbf2   : > { %v4455_v45 = vcombine.low %v422_v15, %v430_v44 }
 0xbf3   : > { %v2306_v50 = vsel %vm784_vm1, %v2304_v49, 0.0  ;;  %v2305_v52 = vadd.f32 %v5191_v51, %v2301_v46  ;;  %v4456_v46 = vcombine.high %v422_v15, %v430_v44  ;;  %2837 = vmatprep.subr.bf16.mxu0 %v4454_v43  ;;  %v448_v15 = vld [vmem:[%s5314_s20 + $0xe8] sm:$0xff]  ;;  %v4459_v43 = vcombine.low %v424_v19, %v432_v31  ;;  %v473_v31 = vld [vmem:[%s5314_s20 + $0x1b0] sm:$0xff] }
 0xbf4   : > { %2307 = vadd.xlane.f32.xlu0 %v2306_v50  ;;  %v4474_v44 = vcombine.high %v439_v34, %v447_v37 }
 0xbf5   : > { %v2309_v53 = vsel %vm784_vm1, %v2305_v52, 0.0  ;;  %2880 = vmatprep.subr.bf16.mxu1 %v4456_v46  ;;  %v455_v46 = vld [vmem:[%s5314_s20 + $0x120] sm:$0xff] }
 0xbf6   : > { %2310 = vadd.xlane.f32.xlu1 %v2309_v53  ;;  %v5597_v53 = vsub.s32 4, %v5342_v7 }
 0xc81   : > { %v2308_v54 = vpop.xlane.xlu0 %2307 }
 0xc82   : > { %v2313_v56 = vmul.f32 0.015625, %v2308_v54 }
 0xc83   : > { %v2311_v57 = vpop.xlane.xlu1 %2310 }
 0xc84   : > { %v5566_v58 = vsub.f32 %v2304_v49, %v2313_v56  ;;  %v2314_v59 = vmul.f32 0.015625, %v2311_v57  ;;  %v2336_v56 = vrot.slane %v5560_v41, %v5597_v53  ;;  %v5602_v57 = vsub.s32 5, %v5342_v7 }
 0xc86   : > { %v5568_v42 = vsub.f32 %v2305_v52, %v2314_v59  ;;  %v2317_v60 = vmul.f32 %v5566_v58, %v5566_v58 }
 0xc88   : > { %v2319_v61 = vsel %vm784_vm1, %v2317_v60, 0.0  ;;  %v2318_v0 = vmul.f32 %v5568_v42, %v5568_v42 }
 0xc89   : > { %2320 = vadd.xlane.f32.xlu0 %v2319_v61  ;;  %v2342_v61 = vrot.slane %v5560_v41, %v5602_v57  ;;  %v4472_v41 = vcombine.high %v438_v4, %v446_v6  ;;  %v433_v4 = vld [vmem:[%s5314_s20 + $0x70] sm:$0xff]  ;;  %v426_v6 = vld [vmem:[%s5314_s20 + $0x38] sm:$0xff] }
 0xc8a   : > { %v2322_v1 = vsel %vm784_vm1, %v2318_v0, 0.0 }
 0xc8d   : > { %2323 = vadd.xlane.f32.xlu0 %v2322_v1 }
 0xd16   : > { %v2321_v47 = vpop.xlane.xlu0 %2320 }
 0xd17   : > { %v2325_v48 = vmul.f32 0.015625, %v2321_v47  ;;  %v463_v47 = vld [vmem:[%s5314_s20 + $0x160] sm:$0xff] }
 0xd19   : > { %v2327_v49 = vadd.f32 1e-05, %v2325_v48  ;;  %v456_v48 = vld [vmem:[%s5314_s20 + $0x128] sm:$0xff] }
 0xd1a   : > { %v2324_v50 = vpop.xlane.xlu0 %2323 }
 0xd1b   : > { %5181 = vrsqrt.f32 %v2327_v49  ;;  %v2326_v51 = vmul.f32 0.015625, %v2324_v50  ;;  %v464_v49 = vld [vmem:[%s5314_s20 + $0x168] sm:$0xff]  ;;  %v4473_v50 = vcombine.low %v439_v34, %v447_v37 }
 0xd1d   : > { %v2328_v52 = vadd.f32 1e-05, %v2326_v51  ;;  %v4475_v51 = vcombine.low %v440_v39, %v448_v15 }
 0xd1f   : > { %5183 = vrsqrt.f32 %v2328_v52  ;;  %v4490_v52 = vcombine.high %v455_v46, %v463_v47 }
 0xd25   : > { %v5182_v54 = vpop.eup %5181 }
 0xd26   : > { %v2331_v59 = vmul.f32 %v5182_v54, %v5566_v58  ;;  %v4492_v54 = vcombine.high %v456_v48, %v464_v49 }
 0xd28   : > { %v2337_v0 = vmul.f32 %v2336_v56, %v2331_v59  ;;  %v479_v59 = vld [vmem:[%s5314_s20 + $0x1e0] sm:$0xff] }
 0xd29   : > { %v5184_v60 = vpop.eup %5183 }
 0xd2a   : > { %v2332_v1 = vmul.f32 %v5184_v60, %v5568_v42  ;;  %v5612_v8 = vadd.f32 %v2342_v61, %v2337_v0  ;;  %v461_v42 = vld [vmem:[%s5314_s20 + $0x150] sm:$0xff]  ;;  %v472_v60 = vld [vmem:[%s5314_s20 + $0x1a8] sm:$0xff]  ;;  %v4489_v0 = vcombine.low %v455_v46, %v463_v47 }
 0xd2b   : > { %v4486_v13 = vcombine.high %v453_v55, %v461_v42  ;;  %v4485_v22 = vcombine.low %v453_v55, %v461_v42  ;;  %v4462_v42 = vcombine.high %v425_v3, %v433_v4  ;;  %v5025_v46 = vld [vmem:[%s5329_s11 + $0x48] sm:$0xff]  }
 0xd2c   : > { %v2338_v2 = vmul.f32 %v2336_v56, %v2332_v1  ;;  %v471_v56 = vld [vmem:[%s5314_s20 + $0x1a0] sm:$0xff]  ;;  %v4491_v1 = vcombine.low %v456_v48, %v464_v49  ;;  %v5026_v47 = vld [vmem:[%s5329_s11 + $0xc8] sm:$0xff]  }
 0xd2d   : > { %v5027_v48 = vld [vmem:[%s5329_s11 + $0x8] sm:$0xff]  }
 0xd2e   : > { %v5614_v29 = vadd.f32 %v2342_v61, %v2338_v2  ;;  %v480_v61 = vld [vmem:[%s5314_s20 + $0x1e8] sm:$0xff]  ;;  %v4506_v2 = vcombine.high %v471_v56, %v479_v59 }
 0xd2f   : > { %v4508_v38 = vcombine.high %v472_v60, %v480_v61  ;;  %v4507_v55 = vcombine.low %v472_v60, %v480_v61  ;;  %v5028_v49 = vld [vmem:[%s5329_s11 + $0x88] sm:$0xff]   ;;  %v5036_v60 = vld [vmem:[%s5329_s11 + $0x98] sm:$0xff]   ;;  %v5037_v61 = vld [vmem:[%s5329_s11 + $0x60] sm:$0xff]  }
 0xd30   : > { %v5618_v58 = vpack.c.bf16 %v5614_v29, %v5612_v8 }
 0xd32   : > { %4513 = vmatmul.mubr.msk.bf16.vlgmr.msra.gmra.mrb[20].mxu0 %vm784_vm1, %v5618_v58  ;;  %4514 = vmatmul.mubr.msk.bf16.vlgmr.msra.gmra.mrb[24].mxu1 %vm784_vm1, %v5618_v58 }
 0xd33   : > { %2838 = vmatpush1.bf16.msra.mxu0 %v4453_v12  ;;  %2881 = vmatpush1.bf16.msra.mxu1 %v4455_v45  ;;  %v4457_v12 = vcombine.low %v423_v26, %v431_v28  ;;  %v4476_v45 = vcombine.high %v440_v39, %v448_v15 }
 0xd34   : > { %2839 = vmatprep.subr.bf16.mxu0 %v4470_v36  ;;  %2882 = vmatprep.subr.bf16.mxu1 %v4472_v41  ;;  %v434_v36 = vld [vmem:[%s5314_s20 + $0x78] sm:$0xff]  ;;  %v4505_v41 = vcombine.low %v471_v56, %v479_v59 }
 0xd35   : > { %2869 = vmatprep.mubr.bf16.mxu0 %v5231_v5  ;;  %2912 = vmatprep.mubr.bf16.mxu1 %v5231_v5  ;;  %v4464_v62 = vcombine.high %v426_v6, %v434_v36  ;;  %v4463_v16 = vcombine.low %v426_v6, %v434_v36  ;;  %v5034_v56 = vld [vmem:[%s5329_s11 + $0xd8] sm:$0xff]   ;;  %v5044_v6 = vld [vmem:[%s5329_s11 + $0xa8] sm:$0xff]   ;;  %v5045_v36 = vld [vmem:[%s5329_s11 + $0x70] sm:$0xff]  }
 0xd36   : > { %v5035_v59 = vld [vmem:[%s5329_s11 + $0x18] sm:$0xff]  }
 0xd37   : > { %2840 = vmatpush1.bf16.msra.mxu0 %v4469_v9  ;;  %2883 = vmatpush1.bf16.msra.mxu1 %v4471_v11  ;;  %v449_v9 = vld [vmem:[%s5314_s20 + $0xf0] sm:$0xff]  ;;  %v442_v11 = vld [vmem:[%s5314_s20 + $0xb8] sm:$0xff] }
 0xd38   : > { %2841 = vmatprep.subr.bf16.mxu0 %v4486_v13  ;;  %2884 = vmatprep.subr.bf16.mxu1 %v4488_v14  ;;  %v450_v13 = vld [vmem:[%s5314_s20 + $0xf8] sm:$0xff]  ;;  %v4461_v14 = vcombine.low %v425_v3, %v433_v4  ;;  %v4478_v17 = vcombine.high %v441_v63, %v449_v9  ;;  %v5042_v3 = vld [vmem:[%s5329_s11 + $0xe8] sm:$0xff]  }
 0xd39   : > { %v4480_v18 = vcombine.high %v442_v11, %v450_v13  ;;  %v4479_v26 = vcombine.low %v442_v11, %v450_v13  ;;  %v5043_v4 = vld [vmem:[%s5329_s11 + $0x28] sm:$0xff]   ;;  %v5052_v11 = vld [vmem:[%s5329_s11 + $0xb8] sm:$0xff]   ;;  %v5053_v13 = vld [vmem:[%s5329_s11 + $0x140] sm:$0xff]  }
 0xd3b   : > { %2842 = vmatpush1.bf16.msra.mxu0 %v4485_v22  ;;  %2885 = vmatpush1.bf16.msra.mxu1 %v4487_v24  ;;  %v465_v22 = vld [vmem:[%s5314_s20 + $0x170] sm:$0xff]  ;;  %v458_v24 = vld [vmem:[%s5314_s20 + $0x138] sm:$0xff] }
 0xd3c   : > { %2843 = vmatprep.subr.bf16.mxu0 %v4502_v27  ;;  %2886 = vmatprep.subr.bf16.mxu1 %v4504_v25  ;;  %v466_v27 = vld [vmem:[%s5314_s20 + $0x178] sm:$0xff]  ;;  %v4477_v25 = vcombine.low %v441_v63, %v449_v9  ;;  %v4494_v28 = vcombine.high %v457_v20, %v465_v22 }
 0xd3d   : > { %v4496_v19 = vcombine.high %v458_v24, %v466_v27  ;;  %v4495_v34 = vcombine.low %v458_v24, %v466_v27  ;;  %v5050_v63 = vld [vmem:[%s5329_s11 + $0xf8] sm:$0xff]  }
 0xd3e   : > { %v5051_v9 = vld [vmem:[%s5329_s11 + $0x38] sm:$0xff]  }
 0xd3f   : > { %2844 = vmatpush1.bf16.msra.mxu0 %v4501_v32  ;;  %2887 = vmatpush1.bf16.msra.mxu1 %v4503_v23  ;;  %v481_v32 = vld [vmem:[%s5314_s20 + $0x1f0] sm:$0xff]  ;;  %v474_v23 = vld [vmem:[%s5314_s20 + $0x1b8] sm:$0xff] }
 0xd40   : > { %2923 = vmatprep.subr.bf16.mxu0 %v4458_v33  ;;  %2966 = vmatprep.subr.bf16.mxu1 %v4460_v35  ;;  %v482_v33 = vld [vmem:[%s5314_s20 + $0x1f8] sm:$0xff]  ;;  %v4493_v35 = vcombine.low %v457_v20, %v465_v22  ;;  %v4510_v37 = vcombine.high %v473_v31, %v481_v32  ;;  %v4509_v15 = vcombine.low %v473_v31, %v481_v32  ;;  %s4291_s20 = sshll.u32 %s5241_s15, 4  ;;  %s4292_s20 = int_to_ptr.vmem [resolvable:$true] %s4291_s20 }
 0xd41   : > { %v4512_v39 = vcombine.high %v474_v23, %v482_v33  ;;  %p5200_p9 = scmp.lt.s32.totalorder %s4292_s20, %s4292_s20 }
 0xd42   : > { %4515 = vmatmul.mubr.msk.bf16.vlgmr.msra.gmra.mrb[24].mxu0 %vm784_vm1, %v5618_v58  ;;  %4516 = vmatmul.mubr.msk.bf16.vlgmr.msra.gmra.mrb[28].mxu1 %vm784_vm1, %v5618_v58 }
 0xd43   : > { %2924 = vmatpush1.bf16.msra.mxu0 %v4457_v12  ;;  %2967 = vmatpush1.bf16.msra.mxu1 %v4459_v43  ;;  %v4511_v12 = vcombine.low %v474_v23, %v482_v33  ;;  %v5022_v43 = vld [vmem:[%s5329_s11 + $0xc0] sm:$0xff]  }
 0xd44   : > { %2925 = vmatprep.subr.bf16.mxu0 %v4474_v44  ;;  %2968 = vmatprep.subr.bf16.mxu1 %v4476_v45  ;;  %v5023_v44 = vld [vmem:[%s5329_s11] sm:$0xff]  }
 0xd45   : > { %2955 = vmatprep.mubr.bf16.mxu0 %v5231_v5  ;;  %2998 = vmatprep.mubr.bf16.mxu1 %v5231_v5  ;;  %v5024_v45 = vld [vmem:[%s5329_s11 + $0x80] sm:$0xff]  }
 0xd47   : > { %2926 = vmatpush1.bf16.msra.mxu0 %v4473_v50  ;;  %2969 = vmatpush1.bf16.msra.mxu1 %v4475_v51  ;;  %v5029_v50 = vld [vmem:[%s5329_s11 + $0x50] sm:$0xff]  }
 0xd48   : > { %2927 = vmatprep.subr.bf16.mxu0 %v4490_v52  ;;  %2970 = vmatprep.subr.bf16.mxu1 %v4492_v54  ;;  %v5030_v51 = vld [vmem:[%s5329_s11 + $0xd0] sm:$0xff]  }
 0xd49   : > { %v5031_v52 = vld [vmem:[%s5329_s11 + $0x10] sm:$0xff]  }
 0xd4a   : > { %v5032_v54 = vld [vmem:[%s5329_s11 + $0x90] sm:$0xff]  }
 0xd4b   : > { %2928 = vmatpush1.bf16.msra.mxu0 %v4489_v0  ;;  %2971 = vmatpush1.bf16.msra.mxu1 %v4491_v1  ;;  %v5038_v0 = vld [vmem:[%s5329_s11 + $0xe0] sm:$0xff]  }
 0xd4c   : > { %2929 = vmatprep.subr.bf16.mxu0 %v4506_v2  ;;  %2972 = vmatprep.subr.bf16.mxu1 %v4508_v38  ;;  %v5039_v1 = vld [vmem:[%s5329_s11 + $0x20] sm:$0xff]   ;;  %v5041_v38 = vld [vmem:[%s5329_s11 + $0x68] sm:$0xff]  }
 0xd4d   : > { %v5040_v2 = vld [vmem:[%s5329_s11 + $0xa0] sm:$0xff]  }
 0xd4f   : > { %2930 = vmatpush1.bf16.msra.mxu0 %v4505_v41  ;;  %2973 = vmatpush1.bf16.msra.mxu1 %v4507_v55  ;;  %v5046_v41 = vld [vmem:[%s5329_s11 + $0xf0] sm:$0xff]  }
 0xd50   : > { %3009 = vmatprep.subr.bf16.mxu0 %v4462_v42  ;;  %3052 = vmatprep.subr.bf16.mxu1 %v4464_v62  ;;  %v5047_v55 = vld [vmem:[%s5329_s11 + $0x30] sm:$0xff]   ;;  %v5049_v62 = vld [vmem:[%s5329_s11 + $0x78] sm:$0xff]  }
 0xd51   : > { %v5048_v42 = vld [vmem:[%s5329_s11 + $0xb0] sm:$0xff]  }
 0xd52   : > { %4517 = vmatmul.mubr.msk.bf16.vlgmr.msra.gmra.mrb[28].mxu0 %vm784_vm1, %v5618_v58  ;;  %4518 = vmatmul.mubr.msk.bf16.vlgmr.msra.gmra.mrb[32].mxu1 %vm784_vm1, %v5618_v58 }
 0xd53   : > { %3010 = vmatpush1.bf16.msra.mxu0 %v4461_v14  ;;  %3053 = vmatpush1.bf16.msra.mxu1 %v4463_v16  ;;  %v5054_v14 = vld [vmem:[%s5329_s11 + $0x1c0] sm:$0xff]  }
 0xd54   : > { %3011 = vmatprep.subr.bf16.mxu0 %v4478_v17  ;;  %3054 = vmatprep.subr.bf16.mxu1 %v4480_v18  ;;  %v483_v16 = vld [vmem:[%s5319_s23] sm:$0xff] }
 0xd55   : > { %3041 = vmatprep.mubr.bf16.mxu0 %v5231_v5  ;;  %3084 = vmatprep.mubr.bf16.mxu1 %v5231_v5  ;;  %v5021_v5 = vld [vmem:[%s5329_s11 + $0x40] sm:$0xff]   ;;  %v2351_v17 = vrot.slane %v483_v16, %v5374_v30  ;;  %v2359_v18 = vrot.slane %v483_v16, %v5362_v21  ;;  %v2355_v20 = vrot.slane %v483_v16, %v5347_v10 }
 0xd56   : > { %v2363_v22 = vrot.slane %v483_v16, %v5557_v40 }
 0xd57   : > { %3012 = vmatpush1.bf16.msra.mxu0 %v4477_v25  ;;  %3055 = vmatpush1.bf16.msra.mxu1 %v4479_v26 }
 0xd58   : > { %3013 = vmatprep.subr.bf16.mxu0 %v4494_v28  ;;  %3056 = vmatprep.subr.bf16.mxu1 %v4496_v19 }
 0xd5b   : > { %3014 = vmatpush1.bf16.msra.mxu0 %v4493_v35  ;;  %3057 = vmatpush1.bf16.msra.mxu1 %v4495_v34 }
 0xd5c   : > { %3015 = vmatprep.subr.bf16.mxu0 %v4510_v37  ;;  %3058 = vmatprep.subr.bf16.mxu1 %v4512_v39 }
 0xd5f   : > { %3016 = vmatpush1.bf16.msra.mxu0 %v4509_v15  ;;  %3059 = vmatpush1.bf16.msra.mxu1 %v4511_v12 }
 0xd60   : > { %4695 = vmatprep.subr.bf16.mxu0 %v5021_v5  ;;  %4717 = vmatprep.subr.bf16.mxu1 %v5022_v43 }
 0xd62   : > { %4519 = vmatmul.mubr.msk.bf16.vlgmr.msra.gmra.mrb[32].mxu0 %vm784_vm1, %v5618_v58  ;;  %4520 = vmatmul.mubr.msk.bf16.vlgmr.msra.gmra.mrb[36].mxu1 %vm784_vm1, %v5618_v58  ;;  %v5033_v58 = vld [vmem:[%s5329_s11 + $0x58] sm:$0xff]  }
 0xd63   : > { %4696 = vmatpush3.bf16.msra.mxu0 %v5023_v44  ;;  %4718 = vmatpush3.bf16.msra.mxu1 %v5024_v45 }
 0xd64   : > { %4697 = vmatprep.subr.bf16.mxu0 %v5025_v46  ;;  %4719 = vmatprep.subr.bf16.mxu1 %v5026_v47 }
 0xd67   : > { %4698 = vmatpush3.bf16.msra.mxu0 %v5027_v48  ;;  %4720 = vmatpush3.bf16.msra.mxu1 %v5028_v49 }
 0xd68   : > { %4699 = vmatprep.subr.bf16.mxu0 %v5029_v50  ;;  %4721 = vmatprep.subr.bf16.mxu1 %v5030_v51 }
 0xd6b   : > { %4700 = vmatpush3.bf16.msra.mxu0 %v5031_v52  ;;  %4722 = vmatpush3.bf16.msra.mxu1 %v5032_v54 }
 0xd6c   : > { %4701 = vmatprep.subr.bf16.mxu0 %v5033_v58  ;;  %4723 = vmatprep.subr.bf16.mxu1 %v5034_v56  ;;  %v5055_v58 = vld [vmem:[%s5329_s11 + $0x100] sm:$0xff]  }
 0xd6d   : > { %v5056_v56 = vld [vmem:[%s5329_s11 + $0x180] sm:$0xff]  }
 0xd6f   : > { %4702 = vmatpush3.bf16.msra.mxu0 %v5035_v59  ;;  %4724 = vmatpush3.bf16.msra.mxu1 %v5036_v60  ;;  %v5057_v59 = vld [vmem:[%s5329_s11 + $0x148] sm:$0xff]  }
 0xd70   : > { %4703 = vmatprep.subr.bf16.mxu0 %v5037_v61  ;;  %4725 = vmatprep.subr.bf16.mxu1 %v5038_v0  ;;  %v5058_v60 = vld [vmem:[%s5329_s11 + $0x1c8] sm:$0xff]   ;;  %v5726_v61 = vsub.s32 6, %v5342_v7  ;;  %v5729_v0 = vsub.s32 7, %v5342_v7  ;;  %v2371_v7 = vrot.slane %v483_v16, %v5602_v57 }
 0xd73   : > { %4704 = vmatpush3.bf16.msra.mxu0 %v5039_v1  ;;  %4726 = vmatpush3.bf16.msra.mxu1 %v5040_v2  ;;  %v5059_v1 = vld [vmem:[%s5329_s11 + $0x108] sm:$0xff]  }
 0xd74   : > { %4705 = vmatprep.subr.bf16.mxu0 %v5041_v38  ;;  %4727 = vmatprep.subr.bf16.mxu1 %v5042_v3  ;;  %v5060_v2 = vld [vmem:[%s5329_s11 + $0x188] sm:$0xff]   ;;  %v2367_v38 = vrot.slane %v483_v16, %v5597_v53  ;;  %v2375_v3 = vrot.slane %v483_v16, %v5726_v61 }
 0xd77   : > { %4706 = vmatpush3.bf16.msra.mxu0 %v5043_v4  ;;  %4728 = vmatpush3.bf16.msra.mxu1 %v5044_v6  ;;  %v5061_v4 = vld [vmem:[%s5329_s11 + $0x150] sm:$0xff]  }
 0xd78   : > { %4707 = vmatprep.subr.bf16.mxu0 %v5045_v36  ;;  %4729 = vmatprep.subr.bf16.mxu1 %v5046_v41  ;;  %v5062_v6 = vld [vmem:[%s5329_s11 + $0x1d0] sm:$0xff]   ;;  %v2379_v36 = vrot.slane %v483_v16, %v5729_v0 }
 0xd7b   : > { %4708 = vmatpush3.bf16.msra.mxu0 %v5047_v55  ;;  %4730 = vmatpush3.bf16.msra.mxu1 %v5048_v42  ;;  %v5063_v42 = vld [vmem:[%s5329_s11 + $0x110] sm:$0xff]  }
 0xd7c   : > { %4709 = vmatprep.subr.bf16.mxu0 %v5049_v62  ;;  %4731 = vmatprep.subr.bf16.mxu1 %v5050_v63  ;;  %v5064_v62 = vld [vmem:[%s5329_s11 + $0x190] sm:$0xff]  }
 0xd7f   : > { %4710 = vmatpush3.bf16.msra.mxu0 %v5051_v9  ;;  %4732 = vmatpush3.bf16.msra.mxu1 %v5052_v11 }
 0xd80   : > { %4739 = vmatprep.subr.bf16.mxu0 %v5053_v13  ;;  %4761 = vmatprep.subr.bf16.mxu1 %v5054_v14  ;;  %v5065_v14 = vld [vmem:[%s5329_s11 + $0x158] sm:$0xff]  }
 0xe05   : > { %v2785_v24 = vpop.f32.mrb[20].mxu0  ;;  %v2828_v27 = vpop.f32.mrb[24].mxu1 }
 0xe06   : > { %v2786_v25 = vadd.f32 %v2785_v24, %v2351_v17  ;;  %v2829_v26 = vadd.f32 %v2828_v27, %v2359_v18  ;;  %v2787_v28 = vpop.f32.mrb[21].mxu0  ;;  %v2830_v19 = vpop.f32.mrb[25].mxu1 }
 0xe07   : > { %v2788_v31 = vadd.f32 %v2787_v28, %v2355_v20  ;;  %v2831_v32 = vadd.f32 %v2830_v19, %v2363_v22  ;;  %v2789_v23 = vpop.f32.mrb[22].mxu0  ;;  %v2832_v33 = vpop.f32.mrb[26].mxu1 }
 0xe08   : > { %v2790_v35 = vadd.f32 %v2789_v23, %v2351_v17  ;;  %v2833_v34 = vadd.f32 %v2832_v33, %v2359_v18  ;;  %v2791_v37 = vpop.f32.mrb[23].mxu0  ;;  %v2834_v39 = vpop.f32.mrb[27].mxu1  ;;  %v3095_v5 = vmax.f32 %v2786_v25, 0.0  ;;  %v3097_v43 = vmax.f32 %v2829_v26, 0.0  ;;  %v5066_v17 = vld [vmem:[%s5329_s11 + $0x1d8] sm:$0xff]  }
 0xe09   : > { %v2792_v15 = vadd.f32 %v2791_v37, %v2355_v20  ;;  %v2835_v12 = vadd.f32 %v2834_v39, %v2363_v22  ;;  %v3096_v46 = vmax.f32 %v2788_v31, 0.0  ;;  %v3098_v47 = vmax.f32 %v2831_v32, 0.0  ;;  %v5067_v31 = vld [vmem:[%s5329_s11 + $0x118] sm:$0xff]   ;;  %v5069_v37 = vld [vmem:[%s5329_s11 + $0x160] sm:$0xff]  }
 0xe0a   : > { %v3111_v44 = vmax.f32 %v2790_v35, 0.0  ;;  %v3113_v45 = vmax.f32 %v2833_v34, 0.0  ;;  %v5068_v32 = vld [vmem:[%s5329_s11 + $0x198] sm:$0xff]   ;;  %v5070_v39 = vld [vmem:[%s5329_s11 + $0x1e0] sm:$0xff]  }
 0xe0b   : > { %v3112_v48 = vmax.f32 %v2792_v15, 0.0  ;;  %v3114_v49 = vmax.f32 %v2835_v12, 0.0 }
 0xe0c   : > { %v3127_v50 = vpack.c.bf16 %v3111_v44, %v3095_v5  ;;  %v3129_v51 = vpack.c.bf16 %v3113_v45, %v3097_v43 }
 0xe0d   : > { %v3128_v52 = vpack.c.bf16 %v3112_v48, %v3096_v46  ;;  %v3130_v54 = vpack.c.bf16 %v3114_v49, %v3098_v47  ;;  %v5071_v48 = vld [vmem:[%s5329_s11 + $0x120] sm:$0xff]  }
 0xe0e   : > { %v5072_v49 = vld [vmem:[%s5329_s11 + $0x1a0] sm:$0xff]  }
 0xe0f   : > { %3947 = vmatprep.mubr.bf16.mxu0 %v3128_v52  ;;  %3988 = vmatprep.mubr.bf16.mxu1 %v3130_v54  ;;  %v5756_v52 = vld [vmem:[%s5319_s23 + $0x8] sm:$0xff]  ;;  %s5193_s23 = scalar_lea.vmem %s4292_s20, 256 }
 0xe10   : > { %3948 = vmatmul.mubr.bf16.vlgmr.msra.gmra.mrb[36].mxu0 %v3127_v50  ;;  %3989 = vmatmul.mubr.bf16.vlgmr.msra.gmra.mrb[40].mxu1 %v3129_v51  ;;  %v5073_v50 = vld [vmem:[%s5329_s11 + $0x168] sm:$0xff]   ;;  %p5194_p6 = scmp.ne.s32.totalorder %s4292_s20, %s5193_s23  ;;  %p5201_p10 = scmp.lt.s32.totalorder %s5193_s23, %s5193_s23 }
 0xe11   : > { %4740 = vmatpush3.bf16.msra.mxu0 %v5055_v58  ;;  %4762 = vmatpush3.bf16.msra.mxu1 %v5056_v56  ;;  %v5074_v51 = vld [vmem:[%s5329_s11 + $0x1e8] sm:$0xff]   ;;  %v2383_v56 = vrot.slane %v5756_v52, %v5374_v30 }
 0xe12   : > { %4741 = vmatprep.subr.bf16.mxu0 %v5057_v59  ;;  %4763 = vmatprep.subr.bf16.mxu1 %v5058_v60  ;;  %v5075_v54 = vld [vmem:[%s5329_s11 + $0x128] sm:$0xff]   ;;  %v2391_v59 = vrot.slane %v5756_v52, %v5362_v21  ;;  %v5077_v60 = vld [vmem:[%s5329_s11 + $0x170] sm:$0xff]   ;;  %p5195_p7 = pnand %p5194_p6, %p4967_p5  ;;  %p5202_p11 = por %p5201_p10, %p5200_p9 }
 0xe13   : > { %v5076_v58 = vld [vmem:[%s5329_s11 + $0x1a8] sm:$0xff]  }
 0xe14   : > { %p5196_p8 = pneg %p5195_p7 }
 0xe15   : > { %v2871_v41 = vpop.f32.mrb[24].mxu0  ;;  %v2914_v55 = vpop.f32.mrb[28].mxu1  ;;  %4742 = vmatpush3.bf16.msra.mxu0 %v5059_v1  ;;  %4764 = vmatpush3.bf16.msra.mxu1 %v5060_v2  ;;  %v5078_v1 = vld [vmem:[%s5329_s11 + $0x1f0] sm:$0xff]   ;;  %v2387_v2 = vrot.slane %v5756_v52, %v5347_v10 }
 0xe16   : > { %v2872_v63 = vadd.f32 %v2871_v41, %v2367_v38  ;;  %v2915_v9 = vadd.f32 %v2914_v55, %v2375_v3  ;;  %v2873_v11 = vpop.f32.mrb[25].mxu0  ;;  %v2916_v13 = vpop.f32.mrb[29].mxu1  ;;  %4743 = vmatprep.subr.bf16.mxu0 %v5061_v4  ;;  %4765 = vmatprep.subr.bf16.mxu1 %v5062_v6  ;;  %v5079_v6 = vld [vmem:[%s5329_s11 + $0x130] sm:$0xff]   ;;  %p5203_p12 = pnand %p5202_p11, %p5196_p8 }
 0xe17   : > { %v2874_v18 = vadd.f32 %v2873_v11, %v2371_v7  ;;  %v2917_v20 = vadd.f32 %v2916_v13, %v2379_v36  ;;  %v2875_v22 = vpop.f32.mrb[26].mxu0  ;;  %v2918_v16 = vpop.f32.mrb[30].mxu1 }
 0xe18   : > { %v2876_v24 = vadd.f32 %v2875_v22, %v2367_v38  ;;  %v2919_v27 = vadd.f32 %v2918_v16, %v2375_v3  ;;  %v2877_v25 = vpop.f32.mrb[27].mxu0  ;;  %v2920_v26 = vpop.f32.mrb[31].mxu1  ;;  %v3099_v23 = vmax.f32 %v2872_v63, 0.0  ;;  %v3101_v33 = vmax.f32 %v2915_v9, 0.0  ;;  %v5083_v22 = vld [vmem:[%s5329_s11 + $0x138] sm:$0xff]  }
 0xe19   : > { %v2878_v28 = vadd.f32 %v2877_v25, %v2371_v7  ;;  %v2921_v19 = vadd.f32 %v2920_v26, %v2379_v36  ;;  %4744 = vmatpush3.bf16.msra.mxu0 %v5063_v42  ;;  %4766 = vmatpush3.bf16.msra.mxu1 %v5064_v62  ;;  %v3100_v15 = vmax.f32 %v2874_v18, 0.0  ;;  %v3102_v12 = vmax.f32 %v2917_v20, 0.0  ;;  %v5080_v7 = vld [vmem:[%s5329_s11 + $0x1b0] sm:$0xff]   ;;  %v5081_v42 = vld [vmem:[%s5329_s11 + $0x178] sm:$0xff]  }
 0xe1a   : > { %v3115_v35 = vmax.f32 %v2876_v24, 0.0  ;;  %v3117_v34 = vmax.f32 %v2919_v27, 0.0  ;;  %4745 = vmatprep.subr.bf16.mxu0 %v5065_v14  ;;  %4767 = vmatprep.subr.bf16.mxu1 %v5066_v17  ;;  %v2395_v38 = vrot.slane %v5756_v52, %v5557_v40  ;;  %v5082_v62 = vld [vmem:[%s5329_s11 + $0x1f8] sm:$0xff]  }
 0xe1b   : > { %v3116_v5 = vmax.f32 %v2878_v28, 0.0  ;;  %v3118_v43 = vmax.f32 %v2921_v19, 0.0  ;;  %v5084_v16 = vld [vmem:[%s5329_s11 + $0x1b8] sm:$0xff]   ;;  %v5085_v28 = vld [vmem:[%s5329_s11 + $0x240] sm:$0xff]  }
 0xe1c   : > { %v5747_v44 = vpack.c.bf16 %v3115_v35, %v3099_v23  ;;  %v5749_v45 = vpack.c.bf16 %v3117_v34, %v3101_v33  ;;  %v5086_v19 = vld [vmem:[%s5329_s11 + $0x2c0] sm:$0xff]  }
 0xe1d   : > { %v3132_v46 = vpack.c.bf16 %v3116_v5, %v3100_v15  ;;  %v3134_v47 = vpack.c.bf16 %v3118_v43, %v3102_v12  ;;  %4746 = vmatpush3.bf16.msra.mxu0 %v5067_v31  ;;  %4768 = vmatpush3.bf16.msra.mxu1 %v5068_v32  ;;  %v5087_v15 = vld [vmem:[%s5329_s11 + $0x200] sm:$0xff]   ;;  %v5089_v5 = vld [vmem:[%s5329_s11 + $0x248] sm:$0xff]  }
 0xe1e   : > { %4747 = vmatprep.subr.bf16.mxu0 %v5069_v37  ;;  %4769 = vmatprep.subr.bf16.mxu1 %v5070_v39  ;;  %v5088_v12 = vld [vmem:[%s5329_s11 + $0x280] sm:$0xff]   ;;  %v5090_v43 = vld [vmem:[%s5329_s11 + $0x2c8] sm:$0xff]  }
 0xe1f   : > { %4029 = vmatprep.mubr.bf16.mxu0 %v3132_v46  ;;  %4070 = vmatprep.mubr.bf16.mxu1 %v3134_v47  ;;  %v5091_v46 = vld [vmem:[%s5329_s11 + $0x208] sm:$0xff]   ;;  %v2399_v47 = vrot.slane %v5756_v52, %v5597_v53  ;;  %v5095_v53 = vld [vmem:[%s5329_s11 + $0x210] sm:$0xff]  }
 0xe21   : > { %4748 = vmatpush3.bf16.msra.mxu0 %v5071_v48  ;;  %4770 = vmatpush3.bf16.msra.mxu1 %v5072_v49  ;;  %v2407_v48 = vrot.slane %v5756_v52, %v5726_v61  ;;  %v5092_v49 = vld [vmem:[%s5329_s11 + $0x288] sm:$0xff]  }
 0xe22   : > { %4749 = vmatprep.subr.bf16.mxu0 %v5073_v50  ;;  %4771 = vmatprep.subr.bf16.mxu1 %v5074_v51  ;;  %v5093_v50 = vld [vmem:[%s5329_s11 + $0x250] sm:$0xff]  }
 0xe23   : > { %v5094_v51 = vld [vmem:[%s5329_s11 + $0x2d0] sm:$0xff]  }
 0xe25   : > { %v2957_v3 = vpop.f32.mrb[28].mxu0  ;;  %v3000_v4 = vpop.f32.mrb[32].mxu1  ;;  %4750 = vmatpush3.bf16.msra.mxu0 %v5075_v54  ;;  %4772 = vmatpush3.bf16.msra.mxu1 %v5076_v58 }
 0xe26   : > { %v2958_v36 = vadd.f32 %v2957_v3, %v2383_v56  ;;  %v3001_v41 = vadd.f32 %v3000_v4, %v2391_v59  ;;  %v2959_v55 = vpop.f32.mrb[29].mxu0  ;;  %v3002_v21 = vpop.f32.mrb[33].mxu1  ;;  %4751 = vmatprep.subr.bf16.mxu0 %v5077_v60  ;;  %4773 = vmatprep.subr.bf16.mxu1 %v5078_v1 }
 0xe27   : > { %v2960_v10 = vadd.f32 %v2959_v55, %v2387_v2  ;;  %v3003_v63 = vadd.f32 %v3002_v21, %v2395_v38  ;;  %v2961_v9 = vpop.f32.mrb[30].mxu0  ;;  %v3004_v40 = vpop.f32.mrb[34].mxu1 }
 0xe28   : > { %v2962_v11 = vadd.f32 %v2961_v9, %v2383_v56  ;;  %v3005_v13 = vadd.f32 %v3004_v40, %v2391_v59  ;;  %v2963_v14 = vpop.f32.mrb[31].mxu0  ;;  %v3006_v17 = vpop.f32.mrb[35].mxu1  ;;  %v3103_v24 = vmax.f32 %v2958_v36, 0.0  ;;  %v3105_v27 = vmax.f32 %v3001_v41, 0.0 }
 0xe29   : > { %v2964_v18 = vadd.f32 %v2963_v14, %v2387_v2  ;;  %v3007_v20 = vadd.f32 %v3006_v17, %v2395_v38  ;;  %4752 = vmatpush3.bf16.msra.mxu0 %v5079_v6  ;;  %4774 = vmatpush3.bf16.msra.mxu1 %v5080_v7  ;;  %v3104_v31 = vmax.f32 %v2960_v10, 0.0  ;;  %v3106_v32 = vmax.f32 %v3003_v63, 0.0  ;;  %v5096_v2 = vld [vmem:[%s5329_s11 + $0x290] sm:$0xff]   ;;  %v5097_v38 = vld [vmem:[%s5329_s11 + $0x258] sm:$0xff]  }
 0xe2a   : > { %v3119_v25 = vmax.f32 %v2962_v11, 0.0  ;;  %v3121_v26 = vmax.f32 %v3005_v13, 0.0  ;;  %4753 = vmatprep.subr.bf16.mxu0 %v5081_v42  ;;  %4775 = vmatprep.subr.bf16.mxu1 %v5082_v62  ;;  %v5099_v62 = vld [vmem:[%s5329_s11 + $0x218] sm:$0xff]   ;;  %v5101_v13 = vld [vmem:[%s5329_s11 + $0x260] sm:$0xff]  }
 0xe2b   : > { %v3120_v23 = vmax.f32 %v2964_v18, 0.0  ;;  %v3122_v33 = vmax.f32 %v3007_v20, 0.0  ;;  %v5100_v11 = vld [vmem:[%s5329_s11 + $0x298] sm:$0xff]  }
 0xe2c   : > { %v5778_v35 = vpack.c.bf16 %v3119_v25, %v3103_v24  ;;  %v5780_v34 = vpack.c.bf16 %v3121_v26, %v3105_v27  ;;  %v5103_v26 = vld [vmem:[%s5329_s11 + $0x220] sm:$0xff]  }
 0xe2d   : > { %v3136_v37 = vpack.c.bf16 %v3120_v23, %v3104_v31  ;;  %v3138_v39 = vpack.c.bf16 %v3122_v33, %v3106_v32  ;;  %4754 = vmatpush3.bf16.msra.mxu0 %v5083_v22  ;;  %4776 = vmatpush3.bf16.msra.mxu1 %v5084_v16  ;;  %v5102_v22 = vld [vmem:[%s5329_s11 + $0x2e0] sm:$0xff]   ;;  %v5106_v31 = vld [vmem:[%s5329_s11 + $0x2e8] sm:$0xff]   ;;  %v5109_v33 = vld [vmem:[%s5329_s11 + $0x270] sm:$0xff]  }
 0xe2e   : > { %4783 = vmatprep.subr.bf16.mxu0 %v5085_v28  ;;  %4805 = vmatprep.subr.bf16.mxu1 %v5086_v19  ;;  %v5104_v28 = vld [vmem:[%s5329_s11 + $0x2a0] sm:$0xff]   ;;  %v5105_v19 = vld [vmem:[%s5329_s11 + $0x268] sm:$0xff]  }
 0xe2f   : > { %v5107_v32 = vld [vmem:[%s5329_s11 + $0x228] sm:$0xff]  }
 0xe30   : > { %4030 = vmatmul.mubr.bf16.vlgmr.msra.gmra.mrb[40].mxu0 %v5747_v44  ;;  %4071 = vmatmul.mubr.bf16.vlgmr.msra.gmra.mrb[44].mxu1 %v5749_v45  ;;  %v2403_v44 = vrot.slane %v5756_v52, %v5602_v57  ;;  %v2411_v45 = vrot.slane %v5756_v52, %v5729_v0  ;;  %v5098_v52 = vld [vmem:[%s5329_s11 + $0x2d8] sm:$0xff]   ;;  %v5108_v23 = vld [vmem:[%s5329_s11 + $0x2a8] sm:$0xff]  }
 0xe31   : > { %4784 = vmatpush3.bf16.msra.mxu0 %v5087_v15  ;;  %4111 = vmatprep.mubr.bf16.mxu0 %v3136_v37  ;;  %v5110_v37 = vld [vmem:[%s5329_s11 + $0x2f0] sm:$0xff]  }
 0xe32   : > { %4806 = vmatpush3.bf16.msra.mxu1 %v5088_v12  ;;  %4152 = vmatprep.mubr.bf16.mxu1 %v3138_v39  ;;  %v5111_v39 = vld [vmem:[%s5329_s11 + $0x230] sm:$0xff]   ;;  %v5113_v12 = vld [vmem:[%s5329_s11 + $0x278] sm:$0xff]  }
 0xe33   : > { %4785 = vmatprep.subr.bf16.mxu0 %v5089_v5  ;;  %4807 = vmatprep.subr.bf16.mxu1 %v5090_v43  ;;  %v5112_v15 = vld [vmem:[%s5329_s11 + $0x2b0] sm:$0xff]   ;;  %v5114_v5 = vld [vmem:[%s5329_s11 + $0x2f8] sm:$0xff]  }
 0xe34   : > { %v5115_v43 = vld [vmem:[%s5329_s11 + $0x238] sm:$0xff]  }
 0xe35   : > { %v3043_v54 = vpop.f32.mrb[32].mxu0  ;;  %v3086_v58 = vpop.f32.mrb[36].mxu1  ;;  %4786 = vmatpush3.bf16.msra.mxu0 %v5091_v46  ;;  %v5116_v46 = vld [vmem:[%s5329_s11 + $0x2b8] sm:$0xff]  }
 0xe36   : > { %v3044_v56 = vadd.f32 %v3043_v54, %v2399_v47  ;;  %v3087_v59 = vadd.f32 %v3086_v58, %v2407_v48  ;;  %4808 = vmatpush3.bf16.msra.mxu1 %v5092_v49  ;;  %v3045_v60 = vpop.f32.mrb[33].mxu0  ;;  %v3088_v1 = vpop.f32.mrb[37].mxu1  ;;  %4787 = vmatprep.subr.bf16.mxu0 %v5093_v50  ;;  %v5119_v49 = vld [vmem:[%s5329_s11 + $0x300] sm:$0xff]   ;;  %v5124_v54 = vld [vmem:[%s5329_s11 + $0x388] sm:$0xff]   ;;  %v5125_v58 = vld [vmem:[%s5329_s11 + $0x350] sm:$0xff]  }
 0xe37   : > { %v3046_v3 = vadd.f32 %v3045_v60, %v2403_v44  ;;  %v3089_v57 = vadd.f32 %v3088_v1, %v2411_v45  ;;  %v3047_v4 = vpop.f32.mrb[34].mxu0  ;;  %v3090_v6 = vpop.f32.mrb[38].mxu1  ;;  %4809 = vmatprep.subr.bf16.mxu1 %v5094_v51  ;;  %v5120_v50 = vld [vmem:[%s5329_s11 + $0x380] sm:$0xff]   ;;  %v5123_v51 = vld [vmem:[%s5329_s11 + $0x308] sm:$0xff]   ;;  %v5131_v60 = vld [vmem:[%s5329_s11 + $0x318] sm:$0xff]  }
 0xe38   : > { %v3048_v7 = vadd.f32 %v3047_v4, %v2399_v47  ;;  %v3091_v36 = vadd.f32 %v3090_v6, %v2407_v48  ;;  %v3049_v41 = vpop.f32.mrb[35].mxu0  ;;  %v3092_v55 = vpop.f32.mrb[39].mxu1  ;;  %v3107_v10 = vmax.f32 %v3044_v56, 0.0  ;;  %v3109_v63 = vmax.f32 %v3087_v59, 0.0  ;;  %v5117_v47 = vld [vmem:[%s5329_s11 + $0x340] sm:$0xff]   ;;  %v5129_v56 = vld [vmem:[%s5329_s11 + $0x358] sm:$0xff]  }
 0xe39   : > { %v3050_v21 = vadd.f32 %v3049_v41, %v2403_v44  ;;  %v3093_v42 = vadd.f32 %v3092_v55, %v2411_v45  ;;  %4788 = vmatpush3.bf16.msra.mxu0 %v5095_v53  ;;  %v3108_v14 = vmax.f32 %v3046_v3, 0.0  ;;  %v3110_v17 = vmax.f32 %v3089_v57, 0.0  ;;  %v5118_v48 = vld [vmem:[%s5329_s11 + $0x3c0] sm:$0xff]   ;;  %v5121_v44 = vld [vmem:[%s5329_s11 + $0x348] sm:$0xff]   ;;  %v5126_v53 = vld [vmem:[%s5329_s11 + $0x3d0] sm:$0xff]  }
 0xe3a   : > { %v3123_v9 = vmax.f32 %v3048_v7, 0.0  ;;  %v3125_v40 = vmax.f32 %v3091_v36, 0.0  ;;  %4810 = vmatpush3.bf16.msra.mxu1 %v5096_v2  ;;  %4789 = vmatprep.subr.bf16.mxu0 %v5097_v38  ;;  %v5122_v45 = vld [vmem:[%s5329_s11 + $0x3c8] sm:$0xff]   ;;  %v5130_v59 = vld [vmem:[%s5329_s11 + $0x3d8] sm:$0xff]   ;;  %v5133_v2 = vld [vmem:[%s5329_s11 + $0x360] sm:$0xff]  }
 0xe3b   : > { %v3124_v18 = vmax.f32 %v3050_v21, 0.0  ;;  %v3126_v20 = vmax.f32 %v3093_v42, 0.0  ;;  %4811 = vmatprep.subr.bf16.mxu1 %v5098_v52  ;;  %v5132_v1 = vld [vmem:[%s5329_s11 + $0x398] sm:$0xff]   ;;  %v5134_v38 = vld [vmem:[%s5329_s11 + $0x3e0] sm:$0xff]   ;;  %v5137_v4 = vld [vmem:[%s5329_s11 + $0x368] sm:$0xff]  }
 0xe3c   : > { %v5808_v16 = vpack.c.bf16 %v3123_v9, %v3107_v10  ;;  %v5810_v24 = vpack.c.bf16 %v3125_v40, %v3109_v63  ;;  %v5135_v3 = vld [vmem:[%s5329_s11 + $0x320] sm:$0xff]   ;;  %v5138_v6 = vld [vmem:[%s5329_s11 + $0x3e8] sm:$0xff]   ;;  %v5141_v36 = vld [vmem:[%s5329_s11 + $0x370] sm:$0xff]  }
 0xe3d   : > { %v3140_v27 = vpack.c.bf16 %v3124_v18, %v3108_v14  ;;  %v3142_v25 = vpack.c.bf16 %v3126_v20, %v3110_v17  ;;  %4790 = vmatpush3.bf16.msra.mxu0 %v5099_v62  ;;  %v5136_v57 = vld [vmem:[%s5329_s11 + $0x3a0] sm:$0xff]   ;;  %v5139_v52 = vld [vmem:[%s5329_s11 + $0x328] sm:$0xff]   ;;  %v5142_v41 = vld [vmem:[%s5329_s11 + $0x3f0] sm:$0xff]  }
 0xe3e   : > { %4812 = vmatpush3.bf16.msra.mxu1 %v5100_v11  ;;  %4791 = vmatprep.subr.bf16.mxu0 %v5101_v13  ;;  %v5140_v7 = vld [vmem:[%s5329_s11 + $0x3a8] sm:$0xff]   ;;  %v5143_v55 = vld [vmem:[%s5329_s11 + $0x330] sm:$0xff]   ;;  %v5145_v42 = vld [vmem:[%s5329_s11 + $0x378] sm:$0xff]  }
 0xe3f   : > { %4813 = vmatprep.subr.bf16.mxu1 %v5102_v22  ;;  %v5144_v21 = vld [vmem:[%s5329_s11 + $0x3b0] sm:$0xff]   ;;  %v5146_v62 = vld [vmem:[%s5329_s11 + $0x3f8] sm:$0xff]   ;;  %v5863_v11 = vld [vmem:[%s5324_s30] sm:$0xff] }
 0xe40   : > { %v5147_v10 = vld [vmem:[%s5329_s11 + $0x338] sm:$0xff]   ;;  %v3146_v13 = vrot.slane %v5863_v11, %v5726_v61 }
 0xe41   : > { %4792 = vmatpush3.bf16.msra.mxu0 %v5103_v26  ;;  %v5148_v63 = vld [vmem:[%s5329_s11 + $0x3b8] sm:$0xff]  }
 0xe42   : > { %4814 = vmatpush3.bf16.msra.mxu1 %v5104_v28  ;;  %4793 = vmatprep.subr.bf16.mxu0 %v5105_v19 }
 0xe43   : > { %4815 = vmatprep.subr.bf16.mxu1 %v5106_v31 }
 0xe45   : > { %4794 = vmatpush3.bf16.msra.mxu0 %v5107_v32 }
 0xe46   : > { %4816 = vmatpush3.bf16.msra.mxu1 %v5108_v23  ;;  %4795 = vmatprep.subr.bf16.mxu0 %v5109_v33 }
 0xe47   : > { %4817 = vmatprep.subr.bf16.mxu1 %v5110_v37 }
 0xe49   : > { %4796 = vmatpush3.bf16.msra.mxu0 %v5111_v39 }
 0xe4a   : > { %4818 = vmatpush3.bf16.msra.mxu1 %v5112_v15  ;;  %4797 = vmatprep.subr.bf16.mxu0 %v5113_v12 }
 0xe4b   : > { %4819 = vmatprep.subr.bf16.mxu1 %v5114_v5 }
 0xe4d   : > { %4798 = vmatpush3.bf16.msra.mxu0 %v5115_v43 }
 0xe4e   : > { %4820 = vmatpush3.bf16.msra.mxu1 %v5116_v46  ;;  %4827 = vmatprep.subr.bf16.mxu0 %v5117_v47 }
 0xe4f   : > { %4849 = vmatprep.subr.bf16.mxu1 %v5118_v48 }
 0xe50   : > { %4112 = vmatmul.mubr.bf16.vlgmr.msra.gmra.mrb[44].mxu0 %v5778_v35  ;;  %v5127_v35 = vld [vmem:[%s5329_s11 + $0x310] sm:$0xff]  }
 0xe51   : > { %4153 = vmatmul.mubr.bf16.vlgmr.msra.gmra.mrb[48].mxu1 %v5780_v34  ;;  %4828 = vmatpush3.bf16.msra.mxu0 %v5119_v49  ;;  %v5128_v34 = vld [vmem:[%s5329_s11 + $0x390] sm:$0xff]  }
 0xe52   : > { %4193 = vmatprep.mubr.bf16.mxu0 %v3140_v27  ;;  %4850 = vmatpush3.bf16.msra.mxu1 %v5120_v50 }
 0xe53   : > { %4234 = vmatprep.mubr.bf16.mxu1 %v3142_v25  ;;  %4829 = vmatprep.subr.bf16.mxu0 %v5121_v44 }
 0xe54   : > { %4851 = vmatprep.subr.bf16.mxu1 %v5122_v45 }
 0xe55   : > { %4830 = vmatpush3.bf16.msra.mxu0 %v5123_v51 }
 0xe56   : > { %4852 = vmatpush3.bf16.msra.mxu1 %v5124_v54  ;;  %4831 = vmatprep.subr.bf16.mxu0 %v5125_v58 }
 0xe57   : > { %4853 = vmatprep.subr.bf16.mxu1 %v5126_v53 }
 0xe59   : > { %4832 = vmatpush3.bf16.msra.mxu0 %v5127_v35 }
 0xe5a   : > { %4854 = vmatpush3.bf16.msra.mxu1 %v5128_v34  ;;  %4833 = vmatprep.subr.bf16.mxu0 %v5129_v56 }
 0xe5b   : > { %4855 = vmatprep.subr.bf16.mxu1 %v5130_v59 }
 0xe5d   : > { %4834 = vmatpush3.bf16.msra.mxu0 %v5131_v60 }
 0xe5e   : > { %4856 = vmatpush3.bf16.msra.mxu1 %v5132_v1  ;;  %4835 = vmatprep.subr.bf16.mxu0 %v5133_v2 }
 0xe5f   : > { %4857 = vmatprep.subr.bf16.mxu1 %v5134_v38 }
 0xe61   : > { %4836 = vmatpush3.bf16.msra.mxu0 %v5135_v3 }
 0xe62   : > { %4858 = vmatpush3.bf16.msra.mxu1 %v5136_v57  ;;  %4837 = vmatprep.subr.bf16.mxu0 %v5137_v4 }
 0xe63   : > { %4859 = vmatprep.subr.bf16.mxu1 %v5138_v6 }
 0xe65   : > { %4838 = vmatpush3.bf16.msra.mxu0 %v5139_v52 }
 0xe66   : > { %4860 = vmatpush3.bf16.msra.mxu1 %v5140_v7  ;;  %4839 = vmatprep.subr.bf16.mxu0 %v5141_v36 }
 0xe67   : > { %4861 = vmatprep.subr.bf16.mxu1 %v5142_v41 }
 0xe69   : > { %4840 = vmatpush3.bf16.msra.mxu0 %v5143_v55 }
 0xe6a   : > { %4862 = vmatpush3.bf16.msra.mxu1 %v5144_v21  ;;  %4841 = vmatprep.subr.bf16.mxu0 %v5145_v42 }
 0xe6b   : > { %4863 = vmatprep.subr.bf16.mxu1 %v5146_v62 }
 0xe6d   : > { %4842 = vmatpush3.bf16.msra.mxu0 %v5147_v10 }
 0xe6e   : > { %4864 = vmatpush3.bf16.msra.mxu1 %v5148_v63 }
 0xe70   : > { %4194 = vmatmul.mubr.bf16.vlgmr.msra.gmra.mrb[48].mxu0 %v5808_v16 }
 0xe71   : > { %4235 = vmatmul.mubr.bf16.vlgmr.msra.gmra.mrb[52].mxu1 %v5810_v24 }
 0xee3   : > { %v4711_v9 = vpop.f32.mrb[36].mxu0  ;;  %v4733_v40 = vpop.f32.mrb[40].mxu1 }
 0xee4   : > { %v4712_v14 = vpop.f32.mrb[37].mxu0  ;;  %v4734_v17 = vpop.f32.mrb[41].mxu1 }
 0xee5   : > { %v4713_v18 = vadd.f32 %v4712_v14, %v4711_v9  ;;  %v4735_v20 = vadd.f32 %v4734_v17, %v4733_v40  ;;  %v4714_v22 = vpop.f32.mrb[38].mxu0  ;;  %v4736_v27 = vpop.f32.mrb[42].mxu1 }
 0xee6   : > { %v4715_v25 = vpop.f32.mrb[39].mxu0  ;;  %v4737_v26 = vpop.f32.mrb[43].mxu1 }
 0xee7   : > { %v3950_v28 = vadd.f32 %v4713_v18, %v3146_v13  ;;  %v4716_v19 = vadd.f32 %v4715_v25, %v4714_v22  ;;  %v4738_v16 = vadd.f32 %v4737_v26, %v4736_v27 }
 0xee9   : > { %v3991_v31 = vadd.f32 %v4735_v20, %v3950_v28  ;;  %v3953_v24 = vadd.f32 %v4716_v19, %v3146_v13 }
 0xeeb   : > { %v3994_v32 = vadd.f32 %v4738_v16, %v3953_v24 }
 0xf03   : > { %v4755_v23 = vpop.f32.mrb[40].mxu0  ;;  %v4777_v33 = vpop.f32.mrb[44].mxu1 }
 0xf04   : > { %v4756_v37 = vpop.f32.mrb[41].mxu0  ;;  %v4778_v39 = vpop.f32.mrb[45].mxu1 }
 0xf05   : > { %v4757_v15 = vadd.f32 %v4756_v37, %v4755_v23  ;;  %v4779_v61 = vadd.f32 %v4778_v39, %v4777_v33  ;;  %v4758_v12 = vpop.f32.mrb[42].mxu0  ;;  %v4780_v5 = vpop.f32.mrb[46].mxu1 }
 0xf06   : > { %v4759_v43 = vpop.f32.mrb[43].mxu0  ;;  %v4781_v46 = vpop.f32.mrb[47].mxu1 }
 0xf07   : > { %v4032_v47 = vadd.f32 %v4757_v15, %v3991_v31  ;;  %v4760_v48 = vadd.f32 %v4759_v43, %v4758_v12  ;;  %v4782_v49 = vadd.f32 %v4781_v46, %v4780_v5  ;;  %v742_v5 = vld [vmem:[%s5324_s30 + $0x8] sm:$0xff]  ;;  %v4274_v43 = vrot.slane %v5863_v11, %v5729_v0 }
 0xf09   : > { %v4073_v50 = vadd.f32 %v4779_v61, %v4032_v47  ;;  %v4035_v44 = vadd.f32 %v4760_v48, %v3994_v32  ;;  %v4280_v48 = vrot.slane %v742_v5, %v5374_v30 }
 0xf0b   : > { %v4076_v45 = vadd.f32 %v4782_v49, %v4035_v44 }
 0xf23   : > { %v4799_v51 = vpop.f32.mrb[44].mxu0 }
 0xf24   : > { %v4821_v54 = vpop.f32.mrb[48].mxu1  ;;  %v4800_v58 = vpop.f32.mrb[45].mxu0 }
 0xf25   : > { %v4801_v53 = vadd.f32 %v4800_v58, %v4799_v51  ;;  %v4822_v35 = vpop.f32.mrb[49].mxu1  ;;  %v4802_v34 = vpop.f32.mrb[46].mxu0 }
 0xf26   : > { %v4823_v56 = vadd.f32 %v4822_v35, %v4821_v54  ;;  %v4824_v59 = vpop.f32.mrb[50].mxu1  ;;  %v4803_v60 = vpop.f32.mrb[47].mxu0 }
 0xf27   : > { %v4114_v1 = vadd.f32 %v4801_v53, %v4073_v50  ;;  %v4804_v2 = vadd.f32 %v4803_v60, %v4802_v34  ;;  %v4825_v38 = vpop.f32.mrb[51].mxu1 }
 0xf28   : > { %v4826_v3 = vadd.f32 %v4825_v38, %v4824_v59 }
 0xf29   : > { %v4155_v57 = vadd.f32 %v4823_v56, %v4114_v1  ;;  %v4117_v4 = vadd.f32 %v4804_v2, %v4076_v45 }
 0xf2b   : > { %v4158_v6 = vadd.f32 %v4826_v3, %v4117_v4 }
 0xf43   : > { %v4843_v52 = vpop.f32.mrb[48].mxu0 }
 0xf44   : > { %v4865_v7 = vpop.f32.mrb[52].mxu1  ;;  %v4844_v36 = vpop.f32.mrb[49].mxu0 }
 0xf45   : > { %v4845_v41 = vadd.f32 %v4844_v36, %v4843_v52  ;;  %v4866_v55 = vpop.f32.mrb[53].mxu1  ;;  %v4846_v21 = vpop.f32.mrb[50].mxu0 }
 0xf46   : > { %v4867_v42 = vadd.f32 %v4866_v55, %v4865_v7  ;;  %v4868_v62 = vpop.f32.mrb[54].mxu1  ;;  %v4847_v10 = vpop.f32.mrb[51].mxu0 }
 0xf47   : > { %v4196_v63 = vadd.f32 %v4845_v41, %v4155_v57  ;;  %v4848_v9 = vadd.f32 %v4847_v10, %v4846_v21  ;;  %v4869_v40 = vpop.f32.mrb[55].mxu1 }
 0xf48   : > { %v4870_v13 = vadd.f32 %v4869_v40, %v4868_v62 }
 0xf49   : > { %v4237_v14 = vadd.f32 %v4867_v42, %v4196_v63  ;;  %v4199_v17 = vadd.f32 %v4848_v9, %v4158_v6 }
 0xf4b   : > { %v4240_v18 = vadd.f32 %v4870_v13, %v4199_v17  ;;  %v4243_v20 = vadd.f32 %v4237_v14, %v5612_v8 }
 0xf4d   : > { %v4245_v22 = vsel %vm784_vm1, %v4243_v20, 0.0  ;;  %v4244_v27 = vadd.f32 %v4240_v18, %v5614_v29 }
 0xf4e   : > { %4246 = vadd.xlane.f32.xlu1 %v4245_v22 }
 0xf4f   : > { %v4248_v25 = vsel %vm784_vm1, %v4244_v27, 0.0 }
 0xf50   : > { %4249 = vadd.xlane.f32.xlu0 %v4248_v25 }
 0xfdb   : > { %v4247_v26 = vpop.xlane.xlu1 %4246 }
 0xfdc   : > { %v4251_v28 = vmul.f32 0.015625, %v4247_v26 }
 0xfdd   : > { %v4250_v19 = vpop.xlane.xlu0 %4249 }
 0xfde   : > { %v4253_v16 = vsub.f32 %v4243_v20, %v4251_v28  ;;  %v4252_v31 = vmul.f32 0.015625, %v4250_v19 }
 0xfe0   : > { %v4254_v24 = vsub.f32 %v4244_v27, %v4252_v31  ;;  %v4255_v32 = vmul.f32 %v4253_v16, %v4253_v16 }
 0xfe2   : > { %v4257_v23 = vsel %vm784_vm1, %v4255_v32, 0.0  ;;  %v4256_v33 = vmul.f32 %v4254_v24, %v4254_v24 }
 0xfe3   : > { %4258 = vadd.xlane.f32.xlu1 %v4257_v23 }
 0xfe4   : > { %v4260_v8 = vsel %vm784_vm1, %v4256_v33, 0.0 }
 0xfe5   : > { %4261 = vadd.xlane.f32.xlu0 %v4260_v8 }
0x1070   : > { %v4259_v29 = vpop.xlane.xlu1 %4258 }
0x1071   : > { %v4263_v37 = vmul.f32 0.015625, %v4259_v29 }
0x1072   : > { %v4262_v39 = vpop.xlane.xlu0 %4261 }
0x1073   : > { %v4265_v15 = vadd.f32 1e-05, %v4263_v37  ;;  %v4264_v61 = vmul.f32 0.015625, %v4262_v39 }
0x1075   : > { %5185 = vrsqrt.f32 %v4265_v15  ;;  %v4266_v12 = vadd.f32 1e-05, %v4264_v61 }
0x1077   : > { %5187 = vrsqrt.f32 %v4266_v12 }
0x107f   : > { %v5186_v46 = vpop.eup %5185 }
0x1080   : > { %v4269_v47 = vmul.f32 %v5186_v46, %v4253_v16 }
0x1081   : > { %v5188_v49 = vpop.eup %5187 }
0x1082   : > { %v4275_v50 = vmul.f32 %v4274_v43, %v4269_v47  ;;  %v4270_v44 = vmul.f32 %v5188_v49, %v4254_v24 }
0x1084   : > { %v4276_v45 = vmul.f32 %v4274_v43, %v4270_v44  ;;  %v4281_v51 = vadd.f32 %v4280_v48, %v4275_v50 }
0x1086   : > { %v4282_v54 = vadd.f32 %v4280_v48, %v4276_v45  ;;  %4283 = vst.msk [vmem:[#allocation2] sm:$0xff] %vm784_vm1, %v4281_v51 }
0x1088   : > { %4284 = vst.msk [vmem:[#allocation2 + $0x8] sm:$0xff] %vm784_vm1, %v4282_v54 }
0x1089   : > { %5206 = shalt.err (!%p5203_p12)
}
0x108a   : > { %s5207_s13 = scalar_lea.hbm %s5913_s8, 256 }
0x108b   : > { %p5208_p13 = scmp.ne.s32.totalorder %s5913_s8, %s5207_s13  ;;  %p5213_p2 = scmp.lt.u32.totalorder %s5207_s13, %s5913_s8 }
0x108d   : > { %p5209_p0 = pnand %p5208_p13, %p4967_p5 }
0x108f   : > { %p5210_p1 = pneg %p5209_p0 }
0x1091   : > { %p5215_p3 = pnand %p5213_p2, %p5210_p1 }
0x1093   : > { %5218 = shalt.err (!%p5215_p3)
}
0x1094   : > { %s5242_s12 = smov 128   ;;  %s5243_s18 = smov 8  }
0x1095   : > { %4964 = dma.vmem_to_hbm [thread:$0]  (%p4967_p5), %s4292_s20, 256, %s5913_s8, [#allocation3], %s5242_s12, %s5242_s12, %s5243_s18  }
0x1096   : > { %5224 = dma.done.wait (%p4967_p5), [#allocation3], 256  }
0x1097   : > { %5226 = vsyncadd (%p4967_p5), [#allocation3], 4294967040 }
0x1098 PF: > { %s19_s27 = sadd.s32 1, %s5229_s27  }
0x1099   : > { %p16_p4 = scmp.ge.s32.totalorder %s19_s27, 6  }
0x109b   :  { %18 = sbr.rel (!%p16_p4) target bundleno = 1 (0x1), region = 98 }
0x10a2   :  { %4307 = vsyncpa [#allocation3], 1 }
0x10a3   :  { %4309 = vsyncpa [#allocation3 + $0x1], 1 }

</bundles_post_ra>
